<compile_context>
chip_gen: v5e
topology: v5e:2x2
jax: 0.10.0
libtpu: 0.0.40
codegen_flags: <defaults>
</compile_context>

<pallas_src>
import jax
import jax.numpy as jnp
from jax.experimental import pallas as pl
from jax.experimental.pallas import tpu as pltpu

IN_DIM = 360
HID = 256
OUT_DIM = 42
OUT_PAD = 128          # lane-dense padded output width (multiple of 128)
NEG_BIG = -1e30        # padded-logit bias value -> exp() underflows to 0


# -----------------------------------------------------------------------------
# Kernel
# -----------------------------------------------------------------------------
def _phone_nn_kernel(
    x_ref,
    w1_ref, b1_ref,
    w2_ref, b2_ref,
    w3_ref, b3_ref,
    w4_ref, b4_ref,
    w5_ref, b5_ref,
    out_ref,
):
    """One batch tile: 4 x (linear + sigmoid) + linear + softmax (dim=1).

    Weights are (in, out) in the MXU operand dtype (bf16 or f32); biases are
    (1, out) f32.  w5/b5 are padded to OUT_PAD lanes with zero columns /
    NEG_BIG biases, so the softmax assigns the padded lanes probability 0.
    """
    mm_dtype = w1_ref.dtype
    h = x_ref[...]  # (TM, IN_DIM) f32

    def linear(h, w_ref, b_ref):
        # bf16 (or f32) MXU operands, f32 accumulation, f32 bias add.
        return jnp.dot(h.astype(mm_dtype), w_ref[...],
                       preferred_element_type=jnp.float32) + b_ref[...]

    h = jax.nn.sigmoid(linear(h, w1_ref, b1_ref))
    h = jax.nn.sigmoid(linear(h, w2_ref, b2_ref))
    h = jax.nn.sigmoid(linear(h, w3_ref, b3_ref))
    h = jax.nn.sigmoid(linear(h, w4_ref, b4_ref))

    # Final linear (no sigmoid) + softmax over the feature axis.
    logits = linear(h, w5_ref, b5_ref)           # (TM, OUT_PAD); pads = NEG_BIG
    m = jnp.max(logits, axis=-1, keepdims=True)
    e = jnp.exp(logits - m)                      # padded lanes -> exactly 0
    denom = jnp.sum(e, axis=-1, keepdims=True)
    out_ref[...] = (e * pl.reciprocal(denom, approx=False)).astype(out_ref.dtype)


# -----------------------------------------------------------------------------
# One-time parameter repack (NOT in the per-call path)
# -----------------------------------------------------------------------------
def prepare_params(params, matmul_dtype=jnp.bfloat16):
    """Transpose/cast/pad PyTorch-layout params once, outside the jitted call."""
    prepped = []
    for i in range(1, 6):
        w = jnp.asarray(params[f"w{i}"], jnp.float32).T           # (in, out)
        b = jnp.asarray(params[f"b{i}"], jnp.float32).reshape(1, -1)
        if i == 5:  # pad 42 -> 128 output lanes
            pad = OUT_PAD - w.shape[1]
            w = jnp.pad(w, ((0, 0), (0, pad)))                    # zero columns
            b = jnp.pad(b, ((0, 0), (0, pad)), constant_values=NEG_BIG)
        prepped.append(w.astype(matmul_dtype))                    # MXU operand dtype
        prepped.append(b)                                         # bias stays f32
    return tuple(prepped)


def _choose_batch_tile(B):
    """Largest batch tile (multiple of the f32 sublane count 8, capped at 512)
    that evenly divides B; otherwise fall back to one full-array block."""
    for tm in (512, 256, 128, 64, 32, 16, 8):
        if B % tm == 0:
            return tm
    return B


# -----------------------------------------------------------------------------
# Forward wrapper
# -----------------------------------------------------------------------------
@jax.jit
def phone_nn_forward(x, prepped):
    """x: (B, 360) float32.  prepped: output of prepare_params()."""
    B = x.shape[0]
    x = x.astype(jnp.float32)
    tm = _choose_batch_tile(B)
    grid = (B // tm,)

    in_specs = [pl.BlockSpec((tm, IN_DIM), lambda i: (i, 0))]
    for p in prepped:
        # Full-array block, constant index_map -> VMEM-resident across the grid.
        in_specs.append(pl.BlockSpec(p.shape, lambda i: (0, 0)))
    out_specs = pl.BlockSpec((tm, OUT_PAD), lambda i: (i, 0))

    out_pad = pl.pallas_call(
        _phone_nn_kernel,
        out_shape=jax.ShapeDtypeStruct((B, OUT_PAD), jnp.float32),
        grid=grid,
        in_specs=in_specs,
        out_specs=out_specs,
        compiler_params=pltpu.CompilerParams(
            dimension_semantics=("parallel",)),
    )(x, *prepped)

    return out_pad[:, :OUT_DIM]


# -----------------------------------------------------------------------------
# Reference + test
# -----------------------------------------------------------------------------
def init_params(key):
    """Deterministic synthetic parameters matching Phone_NN.__init__ shapes."""
    dims = [(256, 360), (256, 256), (256, 256), (256, 256), (42, 256)]
    params = {}
    for i, (out_d, in_d) in enumerate(dims, start=1):
        key, kw, kb = jax.random.split(key, 3)
        bound = 1.0 / jnp.sqrt(in_d)
        params[f"w{i}"] = jax.random.uniform(
            kw, (out_d, in_d), jnp.float32, minval=-bound, maxval=bound)
        params[f"b{i}"] = jax.random.uniform(
            kb, (out_d,), jnp.float32, minval=-bound, maxval=bound)
    return params


def _reference_forward(x, params):
    """Plain-JAX reference mirroring the PyTorch forward."""
    h = x
    for i in range(1, 5):
        h = jax.nn.sigmoid(h @ params[f"w{i}"].T + params[f"b{i}"])
    logits = h @ params["w5"].T + params["b5"]
    return jax.nn.softmax(logits, axis=1)


if __name__ == "__main__":
    key = jax.random.PRNGKey(0)
    key, kx = jax.random.split(key)
    params = init_params(key)

    prepped_bf16 = prepare_params(params, jnp.bfloat16)   # fast path (default)
    prepped_f32 = prepare_params(params, jnp.float32)     # tight-accuracy path

    for B in (8, 48):  # grid=(1,) and grid=(3,) cases
        x = jax.random.normal(jax.random.fold_in(kx, B), (B, IN_DIM), jnp.float32)
        ref = _reference_forward(x, params)

        # f32 MXU operands: matches the XLA reference tightly.
        out_f32 = jax.block_until_ready(phone_nn_forward(x, prepped_f32))
        assert out_f32.shape == (B, OUT_DIM)
        assert jnp.allclose(out_f32, ref, atol=1e-5, rtol=1e-5)
        assert jnp.allclose(jnp.sum(out_f32, axis=1), jnp.ones((B,)), atol=1e-5)

        # bf16 MXU operands (default): looser tolerance, exact normalization.
        out_bf16 = jax.block_until_ready(phone_nn_forward(x, prepped_bf16))
        assert out_bf16.shape == (B, OUT_DIM)
        assert jnp.allclose(out_bf16, ref, atol=5e-3, rtol=0)
        assert jnp.allclose(jnp.sum(out_bf16, axis=1), jnp.ones((B,)), atol=1e-5)

    print("KERNEL_OK")
</pallas_src>

<mosaic_0001>
module attributes {stable_mosaic.version = 11 : i64} {
  func.func @_phone_nn_kernel(%arg0: i32, %arg1: memref<8x360xf32, #tpu.memory_space<vmem>>, %arg2: memref<360x256xf32, #tpu.memory_space<vmem>>, %arg3: memref<1x256xf32, #tpu.memory_space<vmem>>, %arg4: memref<256x256xf32, #tpu.memory_space<vmem>>, %arg5: memref<1x256xf32, #tpu.memory_space<vmem>>, %arg6: memref<256x256xf32, #tpu.memory_space<vmem>>, %arg7: memref<1x256xf32, #tpu.memory_space<vmem>>, %arg8: memref<256x256xf32, #tpu.memory_space<vmem>>, %arg9: memref<1x256xf32, #tpu.memory_space<vmem>>, %arg10: memref<256x128xf32, #tpu.memory_space<vmem>>, %arg11: memref<1x128xf32, #tpu.memory_space<vmem>>, %arg12: memref<8x128xf32, #tpu.memory_space<vmem>>) attributes {dimension_semantics = [#tpu.dimension_semantics<parallel>], iteration_bounds = array<i64: 1>, scalar_prefetch = 0 : i64, scratch_operands = 0 : i64, tpu.core_type = #tpu.core_type<tc>, window_params = [{transform_indices = @transform_0, window_bounds = array<i64: 8, 360>}, {pipeline_mode = #tpu.pipeline_mode<synchronous>, transform_indices = @transform_1, window_bounds = array<i64: 360, 256>}, {pipeline_mode = #tpu.pipeline_mode<synchronous>, transform_indices = @transform_2, window_bounds = array<i64: 1, 256>}, {pipeline_mode = #tpu.pipeline_mode<synchronous>, transform_indices = @transform_3, window_bounds = array<i64: 256, 256>}, {pipeline_mode = #tpu.pipeline_mode<synchronous>, transform_indices = @transform_4, window_bounds = array<i64: 1, 256>}, {pipeline_mode = #tpu.pipeline_mode<synchronous>, transform_indices = @transform_5, window_bounds = array<i64: 256, 256>}, {pipeline_mode = #tpu.pipeline_mode<synchronous>, transform_indices = @transform_6, window_bounds = array<i64: 1, 256>}, {pipeline_mode = #tpu.pipeline_mode<synchronous>, transform_indices = @transform_7, window_bounds = array<i64: 256, 256>}, {pipeline_mode = #tpu.pipeline_mode<synchronous>, transform_indices = @transform_8, window_bounds = array<i64: 1, 256>}, {pipeline_mode = #tpu.pipeline_mode<synchronous>, transform_indices = @transform_9, window_bounds = array<i64: 256, 128>}, {pipeline_mode = #tpu.pipeline_mode<synchronous>, transform_indices = @transform_10, window_bounds = array<i64: 1, 128>}, {transform_indices = @transform_11, window_bounds = array<i64: 8, 128>}]} {
    %c0 = arith.constant 0 : index
    %c0_0 = arith.constant 0 : index
    %0 = vector.load %arg1[%c0, %c0_0] : memref<8x360xf32, #tpu.memory_space<vmem>>, vector<8x360xf32>
    %c0_1 = arith.constant 0 : index
    %c0_2 = arith.constant 0 : index
    %1 = vector.load %arg2[%c0_1, %c0_2] : memref<360x256xf32, #tpu.memory_space<vmem>>, vector<360x256xf32>
    %cst = arith.constant dense<0.000000e+00> : vector<8x256xf32>
    %2 = tpu.matmul %0, %1, %cst {dimension_numbers = #tpu.dot_dimension_numbers<[1], [0], [0], [1], [0, 0, 1, 1], [], []>} : vector<8x360xf32>, vector<360x256xf32>, vector<8x256xf32> -> vector<8x256xf32>
    %c0_3 = arith.constant 0 : index
    %c0_4 = arith.constant 0 : index
    %3 = vector.load %arg3[%c0_3, %c0_4] : memref<1x256xf32, #tpu.memory_space<vmem>>, vector<1x256xf32>
    %4 = vector.broadcast %3 : vector<1x256xf32> to vector<8x256xf32>
    %5 = arith.addf %2, %4 : vector<8x256xf32>
    %6 = arith.negf %5 : vector<8x256xf32>
    %7 = math.exp %6 : vector<8x256xf32>
    %cst_5 = arith.constant 1.000000e+00 : f32
    %8 = vector.broadcast %cst_5 : f32 to vector<8x256xf32>
    %9 = arith.addf %8, %7 : vector<8x256xf32>
    %10 = arith.divf %8, %9 : vector<8x256xf32>
    %c0_6 = arith.constant 0 : index
    %c0_7 = arith.constant 0 : index
    %11 = vector.load %arg4[%c0_6, %c0_7] : memref<256x256xf32, #tpu.memory_space<vmem>>, vector<256x256xf32>
    %cst_8 = arith.constant dense<0.000000e+00> : vector<8x256xf32>
    %12 = tpu.matmul %10, %11, %cst_8 {dimension_numbers = #tpu.dot_dimension_numbers<[1], [0], [0], [1], [0, 0, 1, 1], [], []>} : vector<8x256xf32>, vector<256x256xf32>, vector<8x256xf32> -> vector<8x256xf32>
    %c0_9 = arith.constant 0 : index
    %c0_10 = arith.constant 0 : index
    %13 = vector.load %arg5[%c0_9, %c0_10] : memref<1x256xf32, #tpu.memory_space<vmem>>, vector<1x256xf32>
    %14 = vector.broadcast %13 : vector<1x256xf32> to vector<8x256xf32>
    %15 = arith.addf %12, %14 : vector<8x256xf32>
    %16 = arith.negf %15 : vector<8x256xf32>
    %17 = math.exp %16 : vector<8x256xf32>
    %cst_11 = arith.constant 1.000000e+00 : f32
    %18 = vector.broadcast %cst_11 : f32 to vector<8x256xf32>
    %19 = arith.addf %18, %17 : vector<8x256xf32>
    %20 = arith.divf %18, %19 : vector<8x256xf32>
    %c0_12 = arith.constant 0 : index
    %c0_13 = arith.constant 0 : index
    %21 = vector.load %arg6[%c0_12, %c0_13] : memref<256x256xf32, #tpu.memory_space<vmem>>, vector<256x256xf32>
    %cst_14 = arith.constant dense<0.000000e+00> : vector<8x256xf32>
    %22 = tpu.matmul %20, %21, %cst_14 {dimension_numbers = #tpu.dot_dimension_numbers<[1], [0], [0], [1], [0, 0, 1, 1], [], []>} : vector<8x256xf32>, vector<256x256xf32>, vector<8x256xf32> -> vector<8x256xf32>
    %c0_15 = arith.constant 0 : index
    %c0_16 = arith.constant 0 : index
    %23 = vector.load %arg7[%c0_15, %c0_16] : memref<1x256xf32, #tpu.memory_space<vmem>>, vector<1x256xf32>
    %24 = vector.broadcast %23 : vector<1x256xf32> to vector<8x256xf32>
    %25 = arith.addf %22, %24 : vector<8x256xf32>
    %26 = arith.negf %25 : vector<8x256xf32>
    %27 = math.exp %26 : vector<8x256xf32>
    %cst_17 = arith.constant 1.000000e+00 : f32
    %28 = vector.broadcast %cst_17 : f32 to vector<8x256xf32>
    %29 = arith.addf %28, %27 : vector<8x256xf32>
    %30 = arith.divf %28, %29 : vector<8x256xf32>
    %c0_18 = arith.constant 0 : index
    %c0_19 = arith.constant 0 : index
    %31 = vector.load %arg8[%c0_18, %c0_19] : memref<256x256xf32, #tpu.memory_space<vmem>>, vector<256x256xf32>
    %cst_20 = arith.constant dense<0.000000e+00> : vector<8x256xf32>
    %32 = tpu.matmul %30, %31, %cst_20 {dimension_numbers = #tpu.dot_dimension_numbers<[1], [0], [0], [1], [0, 0, 1, 1], [], []>} : vector<8x256xf32>, vector<256x256xf32>, vector<8x256xf32> -> vector<8x256xf32>
    %c0_21 = arith.constant 0 : index
    %c0_22 = arith.constant 0 : index
    %33 = vector.load %arg9[%c0_21, %c0_22] : memref<1x256xf32, #tpu.memory_space<vmem>>, vector<1x256xf32>
    %34 = vector.broadcast %33 : vector<1x256xf32> to vector<8x256xf32>
    %35 = arith.addf %32, %34 : vector<8x256xf32>
    %36 = arith.negf %35 : vector<8x256xf32>
    %37 = math.exp %36 : vector<8x256xf32>
    %cst_23 = arith.constant 1.000000e+00 : f32
    %38 = vector.broadcast %cst_23 : f32 to vector<8x256xf32>
    %39 = arith.addf %38, %37 : vector<8x256xf32>
    %40 = arith.divf %38, %39 : vector<8x256xf32>
    %c0_24 = arith.constant 0 : index
    %c0_25 = arith.constant 0 : index
    %41 = vector.load %arg10[%c0_24, %c0_25] : memref<256x128xf32, #tpu.memory_space<vmem>>, vector<256x128xf32>
    %cst_26 = arith.constant dense<0.000000e+00> : vector<8x128xf32>
    %42 = tpu.matmul %40, %41, %cst_26 {dimension_numbers = #tpu.dot_dimension_numbers<[1], [0], [0], [1], [0, 0, 1, 1], [], []>} : vector<8x256xf32>, vector<256x128xf32>, vector<8x128xf32> -> vector<8x128xf32>
    %c0_27 = arith.constant 0 : index
    %c0_28 = arith.constant 0 : index
    %43 = vector.load %arg11[%c0_27, %c0_28] : memref<1x128xf32, #tpu.memory_space<vmem>>, vector<1x128xf32>
    %44 = vector.broadcast %43 : vector<1x128xf32> to vector<8x128xf32>
    %45 = arith.addf %42, %44 : vector<8x128xf32>
    %cst_29 = arith.constant dense<0xFF800000> : vector<8xf32>
    %46 = vector.multi_reduction <maximumf>, %45, %cst_29 [1] : vector<8x128xf32> to vector<8xf32>
    %47 = vector.shape_cast %46 : vector<8xf32> to vector<8x1xf32>
    %48 = vector.broadcast %47 : vector<8x1xf32> to vector<8x128xf32>
    %49 = arith.subf %45, %48 : vector<8x128xf32>
    %50 = math.exp %49 : vector<8x128xf32>
    %cst_30 = arith.constant dense<0.000000e+00> : vector<8xf32>
    %51 = vector.multi_reduction <add>, %50, %cst_30 [1] : vector<8x128xf32> to vector<8xf32>
    %52 = vector.shape_cast %51 : vector<8xf32> to vector<8x1xf32>
    %53 = tpu.reciprocal %52 : vector<8x1xf32> -> vector<8x1xf32>
    %54 = vector.broadcast %53 : vector<8x1xf32> to vector<8x128xf32>
    %55 = arith.mulf %50, %54 : vector<8x128xf32>
    %c0_31 = arith.constant 0 : index
    %c0_32 = arith.constant 0 : index
    %56 = vector.load %arg12[%c0_31, %c0_32] : memref<8x128xf32, #tpu.memory_space<vmem>>, vector<8x128xf32>
    tpu.vector_store %arg12[%c0_31, %c0_32], %55 {strides = array<i32>} : memref<8x128xf32, #tpu.memory_space<vmem>>, vector<8x128xf32>,
    return
  }
  func.func @transform_0(%arg0: i32) -> (i32, i32) {
    %c0_i32 = arith.constant 0 : i32
    %c0_i32_0 = arith.constant 0 : i32
    return %arg0, %c0_i32 : i32, i32
  }
  func.func @transform_1(%arg0: i32) -> (i32, i32) {
    %c0_i32 = arith.constant 0 : i32
    %c0_i32_0 = arith.constant 0 : i32
    %c0_i32_1 = arith.constant 0 : i32
    return %c0_i32, %c0_i32_0 : i32, i32
  }
  func.func @transform_2(%arg0: i32) -> (i32, i32) {
    %c0_i32 = arith.constant 0 : i32
    %c0_i32_0 = arith.constant 0 : i32
    %c0_i32_1 = arith.constant 0 : i32
    return %c0_i32, %c0_i32_0 : i32, i32
  }
  func.func @transform_3(%arg0: i32) -> (i32, i32) {
    %c0_i32 = arith.constant 0 : i32
    %c0_i32_0 = arith.constant 0 : i32
    %c0_i32_1 = arith.constant 0 : i32
    return %c0_i32, %c0_i32_0 : i32, i32
  }
  func.func @transform_4(%arg0: i32) -> (i32, i32) {
    %c0_i32 = arith.constant 0 : i32
    %c0_i32_0 = arith.constant 0 : i32
    %c0_i32_1 = arith.constant 0 : i32
    return %c0_i32, %c0_i32_0 : i32, i32
  }
  func.func @transform_5(%arg0: i32) -> (i32, i32) {
    %c0_i32 = arith.constant 0 : i32
    %c0_i32_0 = arith.constant 0 : i32
    %c0_i32_1 = arith.constant 0 : i32
    return %c0_i32, %c0_i32_0 : i32, i32
  }
  func.func @transform_6(%arg0: i32) -> (i32, i32) {
    %c0_i32 = arith.constant 0 : i32
    %c0_i32_0 = arith.constant 0 : i32
    %c0_i32_1 = arith.constant 0 : i32
    return %c0_i32, %c0_i32_0 : i32, i32
  }
  func.func @transform_7(%arg0: i32) -> (i32, i32) {
    %c0_i32 = arith.constant 0 : i32
    %c0_i32_0 = arith.constant 0 : i32
    %c0_i32_1 = arith.constant 0 : i32
    return %c0_i32, %c0_i32_0 : i32, i32
  }
  func.func @transform_8(%arg0: i32) -> (i32, i32) {
    %c0_i32 = arith.constant 0 : i32
    %c0_i32_0 = arith.constant 0 : i32
    %c0_i32_1 = arith.constant 0 : i32
    return %c0_i32, %c0_i32_0 : i32, i32
  }
  func.func @transform_9(%arg0: i32) -> (i32, i32) {
    %c0_i32 = arith.constant 0 : i32
    %c0_i32_0 = arith.constant 0 : i32
    %c0_i32_1 = arith.constant 0 : i32
    return %c0_i32, %c0_i32_0 : i32, i32
  }
  func.func @transform_10(%arg0: i32) -> (i32, i32) {
    %c0_i32 = arith.constant 0 : i32
    %c0_i32_0 = arith.constant 0 : i32
    %c0_i32_1 = arith.constant 0 : i32
    return %c0_i32, %c0_i32_0 : i32, i32
  }
  func.func @transform_11(%arg0: i32) -> (i32, i32) {
    %c0_i32 = arith.constant 0 : i32
    %c0_i32_0 = arith.constant 0 : i32
    return %arg0, %c0_i32 : i32, i32
  }
}

</mosaic_0001>

<bundles_post_ra>
// kernel: phone_nn_forward.1
= control target key start
LH: loop header
LB: loop body
LE: loop exit
PB: predicated region body
PF: predicated region fallthrough
CT: control target
= control target key end

     0   :  { %16 = vsyncpa [#allocation3], 0  ;;  %s1484_s0 = inlined_call_operand.hbm [shape: f32[8,360], index: 0, kind: input, shape index: {}]   ;;  %s1485_s1 = inlined_call_operand.hbm [shape: f32[360,256], index: 1, kind: input, shape index: {}]   ;;  %s1486_s2 = inlined_call_operand.hbm [shape: f32[1,256], index: 2, kind: input, shape index: {}]   ;;  %s1487_s3 = inlined_call_operand.hbm [shape: f32[256,256], index: 3, kind: input, shape index: {}]   ;;  %s1488_s4 = inlined_call_operand.vmem [shape: f32[1,256], index: 4, kind: input, shape index: {}]   ;;  %s1489_s5 = inlined_call_operand.hbm [shape: f32[256,256], index: 5, kind: input, shape index: {}]   ;;  %s1490_s6 = inlined_call_operand.vmem [shape: f32[1,256], index: 6, kind: input, shape index: {}]   ;;  %s1491_s7 = inlined_call_operand.hbm [shape: f32[256,256], index: 7, kind: input, shape index: {}]   ;;  %s1492_s8 = inlined_call_operand.vmem [shape: f32[1,256], index: 8, kind: input, shape index: {}]   ;;  %s1493_s9 = inlined_call_operand.hbm [shape: f32[256,128], index: 9, kind: input, shape index: {}]   ;;  %s1494_s10 = inlined_call_operand.vmem [shape: f32[1,128], index: 10, kind: input, shape index: {}]   ;;  %s1495_s11 = inlined_call_operand.hbm [shape: f32[8,128], index: 11, kind: output, shape index: {}]  }
   0x1   :  { %17 = vsyncpa [#allocation6], 0 }
   0x2   :  { %18 = vsyncpa [#allocation9], 0 }
   0x3   :  { %19 = vsyncpa [#allocation12], 0  ;;  %s36_s19 = sshll.u32 %s1485_s1, 4  ;;  %s37_s19 = int_to_ptr.hbm [resolvable:$true] %s36_s19 }
   0x4   :  { %20 = vsyncpa [#allocation4], 0  ;;  %s1349_s20 = smov [#allocation5]   ;;  %s60_s24 = sshll.u32 %s1487_s3, 4  ;;  %s61_s24 = int_to_ptr.hbm [resolvable:$true] %s60_s24 }
   0x5   :  { %s38_s21 = sshll.u32 %s1349_s20, 4  ;;  %s1350_s25 = smov 256   ;;  %s39_s21 = int_to_ptr.vmem [resolvable:$true] %s38_s21 }
   0x6   :  { %s1351_s26 = smov 16   ;;  %s1352_s27 = smov [#allocation8]  }
   0x7   :  { %44 = dma.hbm_to_vmem [thread:$0]  %s37_s19, 11520, %s39_s21, [#allocation6], %s1350_s25, %s1350_s25, %s1351_s26  }
   0x8   :  { %s62_s28 = sshll.u32 %s1352_s27, 4  ;;  %s90_s30 = sshll.u32 %s1491_s7, 4  ;;  %s63_s28 = int_to_ptr.vmem [resolvable:$true] %s62_s28  ;;  %s91_s30 = int_to_ptr.hbm [resolvable:$true] %s90_s30 }
   0x9   :  { %68 = dma.hbm_to_vmem [thread:$0]  %s61_s24, 8192, %s63_s28, [#allocation9], %s1350_s25, %s1350_s25, %s1351_s26  }
   0xa   :  { %s26_s13 = sshll.u32 %s1484_s0, 4  ;;  %s1353_s14 = smov [#allocation11]   ;;  %s27_s13 = int_to_ptr.hbm [resolvable:$true] %s26_s13 }
   0xb   :  { %s92_s15 = sshll.u32 %s1353_s14, 4  ;;  %s1354_s16 = smov [#allocation2]   ;;  %s93_s15 = int_to_ptr.vmem [resolvable:$true] %s92_s15 }
   0xc   :  { %98 = dma.hbm_to_vmem [thread:$0]  %s91_s30, 8192, %s93_s15, [#allocation12], %s1350_s25, %s1350_s25, %s1351_s26  }
   0xd   :  { %s28_s7 = sshll.u32 %s1354_s16, 4  ;;  %s50_s19 = sshll.u32 %s1486_s2, 4  ;;  %s29_s7 = int_to_ptr.vmem [resolvable:$true] %s28_s7  ;;  %s51_s19 = int_to_ptr.hbm [resolvable:$true] %s50_s19 }
   0xe   :  { %31 = dma.hbm_to_vmem [thread:$0]  %s27_s13, 384, %s29_s7, [#allocation3]  }
   0xf   :  { %s75_s0 = sshll.u32 %s1489_s5, 4  ;;  %s1355_s22 = smov [#allocation7]   ;;  %s76_s0 = int_to_ptr.hbm [resolvable:$true] %s75_s0 }
  0x10   :  { %s52_s23 = sshll.u32 %s1355_s22, 4  ;;  %s1356_s24 = smov [#allocation10]   ;;  %s53_s23 = int_to_ptr.vmem [resolvable:$true] %s52_s23 }
  0x11   :  { %55 = dma.hbm_to_vmem [thread:$0]  %s51_s19, 32, %s53_s23, [#allocation6]  }
  0x12   :  { %s77_s27 = sshll.u32 %s1356_s24, 4  ;;  %s105_s1 = sshll.u32 %s1493_s9, 4  ;;  %s78_s27 = int_to_ptr.vmem [resolvable:$true] %s77_s27  ;;  %s106_s1 = int_to_ptr.hbm [resolvable:$true] %s105_s1 }
  0x13   :  { %83 = dma.hbm_to_vmem [thread:$0]  %s76_s0, 8192, %s78_s27, [#allocation9], %s1350_s25, %s1350_s25, %s1351_s26  }
  0x14   :  { %s1357_s2 = smov [#allocation13]   ;;  %s1358_s5 = smov 128  }
  0x15   :  { %s107_s30 = sshll.u32 %s1357_s2, 4  ;;  %s1359_s3 = smov 8   ;;  %s108_s30 = int_to_ptr.vmem [resolvable:$true] %s107_s30 }
  0x16   :  { %113 = dma.hbm_to_vmem [thread:$0]  %s106_s1, 4096, %s108_s30, [#allocation12], %s1358_s5, %s1358_s5, %s1359_s3  }
  0x17   :  { %1339 = dma.done.wait [#allocation3], 384  }
  0x18   :  { %1340 = vsyncadd [#allocation3], 4294966912 }
  0x19   :  { %1341 = dma.done.wait [#allocation6], 11552  }
  0x1a   :  { %1342 = vsyncadd [#allocation6], 4294955744 }
  0x1b   :  { %1343 = dma.done.wait [#allocation9], 16384  }
  0x1c   :  { %1344 = vsyncadd [#allocation9], 4294950912 }
  0x1d   :  { %1345 = dma.done.wait [#allocation12], 12288  }
  0x1e   :  { %1346 = vsyncadd [#allocation12], 4294955008  ;;  %v235_v0 = vld [vmem:[#allocation5 + $0x2c0] sm:$0xff]  ;;  %v233_v1 = vld [vmem:[#allocation5 + $0x2b0] sm:$0xff]  ;;  %vm243_vm0 = vcmask 850944   ;;  %s1075_s7 = sshll.u32 %s1495_s11, 4  ;;  %s1076_s7 = int_to_ptr.hbm [resolvable:$true] %s1075_s7 }
  0x1f   :  { %290 = vmatpush.msra.mxu2 %v235_v0  ;;  %v177_v2 = vld [vmem:[#allocation5 + $0xf0] sm:$0xff]  ;;  %v175_v3 = vld [vmem:[#allocation5 + $0xe0] sm:$0xff]  ;;  %v178_v17 = vld [vmem:[#allocation5 + $0xf8] sm:$0xff] }
  0x20   :  { %v231_v4 = vld [vmem:[#allocation5 + $0x2a0] sm:$0xff]  ;;  %247 = vmatpush.msra.mxu0 %v177_v2  ;;  %v209_v5 = vld [vmem:[#allocation5 + $0x1f0] sm:$0xff]  ;;  %307 = vmatpush.msra.mxu3 %v178_v17  ;;  %v176_v21 = vld [vmem:[#allocation5 + $0xe8] sm:$0xff] }
  0x21   :  { %291 = vmatpush.msra.mxu2 %v233_v1  ;;  %267 = vmatpush.msra.mxu1 %v209_v5  ;;  %v173_v6 = vld [vmem:[#allocation5 + $0xd0] sm:$0xff]  ;;  %v207_v7 = vld [vmem:[#allocation5 + $0x1e0] sm:$0xff]  ;;  %v174_v24 = vld [vmem:[#allocation5 + $0xd8] sm:$0xff] }
  0x22   :  { %v229_v8 = vld [vmem:[#allocation5 + $0x290] sm:$0xff]  ;;  %248 = vmatpush.msra.mxu0 %v175_v3  ;;  %v171_v10 = vld [vmem:[#allocation5 + $0xc0] sm:$0xff]  ;;  %308 = vmatpush.msra.mxu3 %v176_v21  ;;  %v172_v26 = vld [vmem:[#allocation5 + $0xc8] sm:$0xff] }
  0x23   :  { %v205_v9 = vld [vmem:[#allocation5 + $0x1d0] sm:$0xff]  ;;  %292 = vmatpush.msra.mxu2 %v231_v4  ;;  %268 = vmatpush.msra.mxu1 %v207_v7  ;;  %v227_v11 = vld [vmem:[#allocation5 + $0x280] sm:$0xff]  ;;  %v170_v30 = vld [vmem:[#allocation5 + $0xb8] sm:$0xff] }
  0x24   :  { %249 = vmatpush.msra.mxu0 %v173_v6  ;;  %v203_v12 = vld [vmem:[#allocation5 + $0x1c0] sm:$0xff]  ;;  %v169_v13 = vld [vmem:[#allocation5 + $0xb0] sm:$0xff]  ;;  %309 = vmatpush.msra.mxu3 %v174_v24  ;;  %v168_v34 = vld [vmem:[#allocation5 + $0xa8] sm:$0xff] }
  0x25   :  { %293 = vmatpush.msra.mxu2 %v229_v8  ;;  %269 = vmatpush.msra.mxu1 %v205_v9  ;;  %v225_v14 = vld [vmem:[#allocation5 + $0x270] sm:$0xff]  ;;  %v167_v16 = vld [vmem:[#allocation5 + $0xa0] sm:$0xff]  ;;  %v166_v38 = vld [vmem:[#allocation5 + $0x98] sm:$0xff] }
  0x26   :  { %250 = vmatpush.msra.mxu0 %v171_v10  ;;  %v201_v15 = vld [vmem:[#allocation5 + $0x1b0] sm:$0xff]  ;;  %v223_v18 = vld [vmem:[#allocation5 + $0x260] sm:$0xff]  ;;  %310 = vmatpush.msra.mxu3 %v172_v26  ;;  %v164_v42 = vld [vmem:[#allocation5 + $0x88] sm:$0xff] }
  0x27   :  { %294 = vmatpush.msra.mxu2 %v227_v11  ;;  %270 = vmatpush.msra.mxu1 %v203_v12  ;;  %v199_v19 = vld [vmem:[#allocation5 + $0x1a0] sm:$0xff]  ;;  %v165_v20 = vld [vmem:[#allocation5 + $0x90] sm:$0xff]  ;;  %v210_v45 = vld [vmem:[#allocation5 + $0x1f8] sm:$0xff] }
  0x28   :  { %251 = vmatpush.msra.mxu0 %v169_v13  ;;  %v221_v22 = vld [vmem:[#allocation5 + $0x250] sm:$0xff]  ;;  %v163_v25 = vld [vmem:[#allocation5 + $0x80] sm:$0xff]  ;;  %311 = vmatpush.msra.mxu3 %v170_v30  ;;  %v1454_v48 = vld [vmem:[#allocation2 + $0x10] sm:$0xff] }
  0x29   :  { %295 = vmatpush.msra.mxu2 %v225_v14  ;;  %271 = vmatpush.msra.mxu1 %v201_v15  ;;  %v197_v23 = vld [vmem:[#allocation5 + $0x190] sm:$0xff]  ;;  %v219_v27 = vld [vmem:[#allocation5 + $0x240] sm:$0xff]  ;;  %v208_v49 = vld [vmem:[#allocation5 + $0x1e8] sm:$0xff] }
  0x2a   :  { %252 = vmatpush.msra.mxu0 %v167_v16  ;;  %v195_v28 = vld [vmem:[#allocation5 + $0x180] sm:$0xff]  ;;  %v161_v29 = vld [vmem:[#allocation5 + $0x70] sm:$0xff]  ;;  %312 = vmatpush.msra.mxu3 %v168_v34  ;;  %v162_v52 = vld [vmem:[#allocation5 + $0x78] sm:$0xff] }
  0x2b   :  { %296 = vmatpush.msra.mxu2 %v223_v18  ;;  %272 = vmatpush.msra.mxu1 %v199_v19  ;;  %v217_v31 = vld [vmem:[#allocation5 + $0x230] sm:$0xff]  ;;  %v159_v33 = vld [vmem:[#allocation5 + $0x60] sm:$0xff]  ;;  %v206_v53 = vld [vmem:[#allocation5 + $0x1d8] sm:$0xff] }
  0x2c   :  { %253 = vmatpush.msra.mxu0 %v165_v20  ;;  %v193_v32 = vld [vmem:[#allocation5 + $0x170] sm:$0xff]  ;;  %v215_v35 = vld [vmem:[#allocation5 + $0x220] sm:$0xff]  ;;  %313 = vmatpush.msra.mxu3 %v166_v38  ;;  %v160_v56 = vld [vmem:[#allocation5 + $0x68] sm:$0xff] }
  0x2d   :  { %297 = vmatpush.msra.mxu2 %v221_v22  ;;  %273 = vmatpush.msra.mxu1 %v197_v23  ;;  %v191_v36 = vld [vmem:[#allocation5 + $0x160] sm:$0xff]  ;;  %v157_v37 = vld [vmem:[#allocation5 + $0x50] sm:$0xff]  ;;  %v204_v57 = vld [vmem:[#allocation5 + $0x1c8] sm:$0xff] }
  0x2e   :  { %254 = vmatpush.msra.mxu0 %v163_v25  ;;  %v213_v39 = vld [vmem:[#allocation5 + $0x210] sm:$0xff]  ;;  %v155_v41 = vld [vmem:[#allocation5 + $0x40] sm:$0xff]  ;;  %314 = vmatpush.msra.mxu3 %v164_v42  ;;  %v144_v59 = vld [vmem:[#allocation2] sm:$0xff] }
  0x2f   :  { %298 = vmatpush.msra.mxu2 %v219_v27  ;;  %274 = vmatpush.msra.mxu1 %v195_v28  ;;  %v189_v40 = vld [vmem:[#allocation5 + $0x150] sm:$0xff]  ;;  %v211_v43 = vld [vmem:[#allocation5 + $0x200] sm:$0xff]  ;;  %v202_v61 = vld [vmem:[#allocation5 + $0x1b8] sm:$0xff] }
  0x30   :  { %255 = vmatpush.msra.mxu0 %v161_v29  ;;  %v187_v44 = vld [vmem:[#allocation5 + $0x140] sm:$0xff]  ;;  %v153_v46 = vld [vmem:[#allocation5 + $0x30] sm:$0xff]  ;;  %315 = vmatpush.msra.mxu3 %v162_v52  ;;  %v236_v63 = vld [vmem:[#allocation5 + $0x2c8] sm:$0xff] }
  0x31   :  { %299 = vmatpush.msra.mxu2 %v217_v31  ;;  %275 = vmatpush.msra.mxu1 %v193_v32  ;;  %v185_v47 = vld [vmem:[#allocation5 + $0x130] sm:$0xff]  ;;  %v151_v50 = vld [vmem:[#allocation5 + $0x20] sm:$0xff]  ;;  %v158_v0 = vld [vmem:[#allocation5 + $0x58] sm:$0xff] }
  0x32   :  { %256 = vmatpush.msra.mxu0 %v159_v33  ;;  %v183_v51 = vld [vmem:[#allocation5 + $0x120] sm:$0xff]  ;;  %v149_v54 = vld [vmem:[#allocation5 + $0x10] sm:$0xff]  ;;  %316 = vmatpush.msra.mxu3 %v160_v56  ;;  %v200_v1 = vld [vmem:[#allocation5 + $0x1a8] sm:$0xff] }
  0x33   :  { %300 = vmatpush.msra.mxu2 %v215_v35  ;;  %276 = vmatpush.msra.mxu1 %v191_v36  ;;  %v181_v55 = vld [vmem:[#allocation5 + $0x110] sm:$0xff]  ;;  %v147_v58 = vld [vmem:[#allocation5] sm:$0xff]  ;;  %v234_v2 = vld [vmem:[#allocation5 + $0x2b8] sm:$0xff] }
  0x34   :  { %257 = vmatpush.msra.mxu0 %v157_v37  ;;  %v179_v60 = vld [vmem:[#allocation5 + $0x100] sm:$0xff]  ;;  %v1458_v62 = vld [vmem:[#allocation2 + $0x8] sm:$0xff]  ;;  %v156_v3 = vld [vmem:[#allocation5 + $0x48] sm:$0xff]  ;;  %317 = vmatpush.msra.mxu3 %v158_v0 }
  0x35   :  { %301 = vmatpush.msra.mxu2 %v213_v39  ;;  %277 = vmatpush.msra.mxu1 %v189_v40  ;;  %v198_v4 = vld [vmem:[#allocation5 + $0x198] sm:$0xff]  ;;  %v232_v5 = vld [vmem:[#allocation5 + $0x2a8] sm:$0xff] }
  0x36   :  { %258 = vmatpush.msra.mxu0 %v155_v41  ;;  %v154_v6 = vld [vmem:[#allocation5 + $0x38] sm:$0xff]  ;;  %v196_v7 = vld [vmem:[#allocation5 + $0x188] sm:$0xff]  ;;  %318 = vmatpush.msra.mxu3 %v156_v3 }
  0x37   :  { %302 = vmatpush.msra.mxu2 %v211_v43  ;;  %278 = vmatpush.msra.mxu1 %v187_v44  ;;  %v230_v8 = vld [vmem:[#allocation5 + $0x298] sm:$0xff]  ;;  %v152_v9 = vld [vmem:[#allocation5 + $0x28] sm:$0xff] }
  0x38   :  { %259 = vmatpush.msra.mxu0 %v153_v46  ;;  %1088 = vmatmul.msk.f32.vlgmr.msra.gmra.mxu2 %vm243_vm0, %v1454_v48  ;;  %v194_v10 = vld [vmem:[#allocation5 + $0x178] sm:$0xff]  ;;  %v228_v11 = vld [vmem:[#allocation5 + $0x288] sm:$0xff] }
  0x39   :  { %327 = vmatpush.msrb.mxu2 %v210_v45  ;;  %279 = vmatpush.msra.mxu1 %v185_v47  ;;  %v150_v12 = vld [vmem:[#allocation5 + $0x18] sm:$0xff]  ;;  %v192_v13 = vld [vmem:[#allocation5 + $0x168] sm:$0xff] }
  0x3a   :  { %260 = vmatpush.msra.mxu0 %v151_v50  ;;  %319 = vmatpush.msra.mxu3 %v154_v6  ;;  %v226_v14 = vld [vmem:[#allocation5 + $0x278] sm:$0xff]  ;;  %v148_v15 = vld [vmem:[#allocation5 + $0x8] sm:$0xff] }
  0x3b   :  { %328 = vmatpush.msrb.mxu2 %v208_v49  ;;  %280 = vmatpush.msra.mxu1 %v183_v51  ;;  %v190_v16 = vld [vmem:[#allocation5 + $0x158] sm:$0xff]  ;;  %v224_v17 = vld [vmem:[#allocation5 + $0x268] sm:$0xff]  ;;  %v1464_v49 = vld [vmem:[#allocation7] sm:$0x3] }
  0x3c   :  { %261 = vmatpush.msra.mxu0 %v149_v54  ;;  %320 = vmatpush.msra.mxu3 %v152_v9  ;;  %v188_v18 = vld [vmem:[#allocation5 + $0x148] sm:$0xff]  ;;  %v222_v19 = vld [vmem:[#allocation5 + $0x258] sm:$0xff]  ;;  %v239_v52 = vperm.slane %v1464_v49, 0 }
  0x3d   :  { %329 = vmatpush.msrb.mxu2 %v206_v53  ;;  %281 = vmatpush.msra.mxu1 %v181_v55  ;;  %v186_v20 = vld [vmem:[#allocation5 + $0x138] sm:$0xff]  ;;  %v220_v21 = vld [vmem:[#allocation5 + $0x248] sm:$0xff] }
  0x3e   :  { %262 = vmatpush.msra.mxu0 %v147_v58  ;;  %321 = vmatpush.msra.mxu3 %v150_v12  ;;  %v184_v22 = vld [vmem:[#allocation5 + $0x128] sm:$0xff]  ;;  %v218_v23 = vld [vmem:[#allocation5 + $0x238] sm:$0xff] }
  0x3f   :  { %330 = vmatpush.msrb.mxu2 %v204_v57  ;;  %263 = vmatmul.f32.vlgmr.msra.gmra.mxu0 %v144_v59  ;;  %v182_v24 = vld [vmem:[#allocation5 + $0x118] sm:$0xff]  ;;  %v216_v25 = vld [vmem:[#allocation5 + $0x228] sm:$0xff] }
  0x40   :  { %282 = vmatpush.msra.mxu1 %v179_v60  ;;  %350 = vmatpush.msrb.mxu0 %v236_v63  ;;  %v180_v26 = vld [vmem:[#allocation5 + $0x108] sm:$0xff]  ;;  %v214_v27 = vld [vmem:[#allocation5 + $0x218] sm:$0xff] }
  0x41   :  { %331 = vmatpush.msrb.mxu2 %v202_v61  ;;  %283 = vmatmul.f32.vlgmr.msra.gmra.mxu1 %v1458_v62  ;;  %v212_v28 = vld [vmem:[#allocation5 + $0x208] sm:$0xff]  ;;  %v433_v31 = vld [vmem:[#allocation8 + $0xe0] sm:$0xff]  ;;  %v434_v32 = vld [vmem:[#allocation8 + $0xe8] sm:$0xff] }
  0x42   :  { %351 = vmatpush.msrb.mxu0 %v234_v2  ;;  %322 = vmatpush.msra.mxu3 %v148_v15  ;;  %v435_v29 = vld [vmem:[#allocation8 + $0xf0] sm:$0xff]  ;;  %v436_v30 = vld [vmem:[#allocation8 + $0xf8] sm:$0xff]  ;;  %v429_v35 = vld [vmem:[#allocation8 + $0xc0] sm:$0xff] }
  0x43   :  { %332 = vmatpush.msrb.mxu2 %v200_v1  ;;  %323 = vmatmul.f32.vlgmr.msra.gmra.mxu3 %v144_v59  ;;  %v431_v33 = vld [vmem:[#allocation8 + $0xd0] sm:$0xff]  ;;  %v432_v34 = vld [vmem:[#allocation8 + $0xd8] sm:$0xff]  ;;  %v430_v36 = vld [vmem:[#allocation8 + $0xc8] sm:$0xff] }
  0x44   :  { %352 = vmatpush.msrb.mxu0 %v232_v5  ;;  %475 = vmatpush.msrb.mxu1 %v435_v29  ;;  %v427_v37 = vld [vmem:[#allocation8 + $0xb0] sm:$0xff]  ;;  %v428_v38 = vld [vmem:[#allocation8 + $0xb8] sm:$0xff]  ;;  %v425_v39 = vld [vmem:[#allocation8 + $0xa0] sm:$0xff] }
  0x45   :  { %333 = vmatpush.msrb.mxu2 %v198_v4  ;;  %v426_v40 = vld [vmem:[#allocation8 + $0xa8] sm:$0xff]  ;;  %v423_v41 = vld [vmem:[#allocation8 + $0x90] sm:$0xff]  ;;  %v424_v42 = vld [vmem:[#allocation8 + $0x98] sm:$0xff] }
  0x46   :  { %353 = vmatpush.msrb.mxu0 %v230_v8  ;;  %476 = vmatpush.msrb.mxu1 %v433_v31  ;;  %v421_v43 = vld [vmem:[#allocation8 + $0x80] sm:$0xff]  ;;  %v422_v44 = vld [vmem:[#allocation8 + $0x88] sm:$0xff]  ;;  %v419_v45 = vld [vmem:[#allocation8 + $0x70] sm:$0xff] }
  0x47   :  { %334 = vmatpush.msrb.mxu2 %v196_v7  ;;  %v420_v46 = vld [vmem:[#allocation8 + $0x78] sm:$0xff]  ;;  %v417_v47 = vld [vmem:[#allocation8 + $0x60] sm:$0xff]  ;;  %v415_v50 = vld [vmem:[#allocation8 + $0x50] sm:$0xff] }
  0x48   :  { %354 = vmatpush.msrb.mxu0 %v228_v11  ;;  %477 = vmatpush.msrb.mxu1 %v431_v33  ;;  %v416_v51 = vld [vmem:[#allocation8 + $0x58] sm:$0xff]  ;;  %v413_v53 = vld [vmem:[#allocation8 + $0x40] sm:$0xff]  ;;  %v414_v54 = vld [vmem:[#allocation8 + $0x48] sm:$0xff] }
  0x49   :  { %335 = vmatpush.msrb.mxu2 %v194_v10  ;;  %v467_v55 = vld [vmem:[#allocation8 + $0x1f0] sm:$0xff]  ;;  %v468_v56 = vld [vmem:[#allocation8 + $0x1f8] sm:$0xff]  ;;  %v466_v63 = vld [vmem:[#allocation8 + $0x1e8] sm:$0xff] }
  0x4a   :  { %355 = vmatpush.msrb.mxu0 %v226_v14  ;;  %478 = vmatpush.msrb.mxu1 %v429_v35  ;;  %v411_v58 = vld [vmem:[#allocation8 + $0x30] sm:$0xff]  ;;  %v412_v59 = vld [vmem:[#allocation8 + $0x38] sm:$0xff]  ;;  %v409_v1 = vld [vmem:[#allocation8 + $0x20] sm:$0xff] }
  0x4b   :  { %336 = vmatpush.msrb.mxu2 %v192_v13  ;;  %495 = vmatpush.msrb.mxu3 %v467_v55  ;;  %v410_v2 = vld [vmem:[#allocation8 + $0x28] sm:$0xff]  ;;  %v463_v4 = vld [vmem:[#allocation8 + $0x1d0] sm:$0xff]  ;;  %v464_v5 = vld [vmem:[#allocation8 + $0x1d8] sm:$0xff] }
  0x4c   :  { %356 = vmatpush.msrb.mxu0 %v224_v17  ;;  %479 = vmatpush.msrb.mxu1 %v427_v37  ;;  %v407_v6 = vld [vmem:[#allocation8 + $0x10] sm:$0xff]  ;;  %v408_v7 = vld [vmem:[#allocation8 + $0x18] sm:$0xff]  ;;  %v461_v9 = vld [vmem:[#allocation8 + $0x1c0] sm:$0xff] }
  0x4d   :  { %337 = vmatpush.msrb.mxu2 %v190_v16  ;;  %v462_v10 = vld [vmem:[#allocation8 + $0x1c8] sm:$0xff]  ;;  %v405_v11 = vld [vmem:[#allocation8] sm:$0xff]  ;;  %v459_v14 = vld [vmem:[#allocation8 + $0x1b0] sm:$0xff] }
  0x4e   :  { %357 = vmatpush.msrb.mxu0 %v222_v19  ;;  %480 = vmatpush.msrb.mxu1 %v425_v39  ;;  %v406_v12 = vld [vmem:[#allocation8 + $0x8] sm:$0xff]  ;;  %v460_v15 = vld [vmem:[#allocation8 + $0x1b8] sm:$0xff]  ;;  %v457_v16 = vld [vmem:[#allocation8 + $0x1a0] sm:$0xff] }
  0x4f   :  { %338 = vmatpush.msrb.mxu2 %v188_v18  ;;  %v458_v17 = vld [vmem:[#allocation8 + $0x1a8] sm:$0xff]  ;;  %v455_v18 = vld [vmem:[#allocation8 + $0x190] sm:$0xff]  ;;  %v456_v19 = vld [vmem:[#allocation8 + $0x198] sm:$0xff] }
  0x50   :  { %358 = vmatpush.msrb.mxu0 %v220_v21  ;;  %481 = vmatpush.msrb.mxu1 %v423_v41  ;;  %v454_v21 = vld [vmem:[#allocation8 + $0x188] sm:$0xff]  ;;  %v448_v29 = vld [vmem:[#allocation8 + $0x158] sm:$0xff]  ;;  %v441_v35 = vld [vmem:[#allocation8 + $0x120] sm:$0xff] }
  0x51   :  { %339 = vmatpush.msrb.mxu2 %v186_v20  ;;  %v453_v20 = vld [vmem:[#allocation8 + $0x180] sm:$0xff]  ;;  %v446_v31 = vld [vmem:[#allocation8 + $0x148] sm:$0xff]  ;;  %v444_v33 = vld [vmem:[#allocation8 + $0x138] sm:$0xff] }
  0x52   :  { %359 = vmatpush.msrb.mxu0 %v218_v23  ;;  %482 = vmatpush.msrb.mxu1 %v421_v43  ;;  %v452_v23 = vld [vmem:[#allocation8 + $0x178] sm:$0xff] }
  0x53   :  { %340 = vmatpush.msrb.mxu2 %v184_v22  ;;  %v451_v22 = vld [vmem:[#allocation8 + $0x170] sm:$0xff]  ;;  %v440_v41 = vld [vmem:[#allocation8 + $0x118] sm:$0xff] }
  0x54   :  { %360 = vmatpush.msrb.mxu0 %v216_v25  ;;  %483 = vmatpush.msrb.mxu1 %v419_v45  ;;  %v449_v25 = vld [vmem:[#allocation8 + $0x160] sm:$0xff] }
  0x55   :  { %341 = vmatpush.msrb.mxu2 %v182_v24 }
  0x56   :  { %361 = vmatpush.msrb.mxu0 %v214_v27  ;;  %484 = vmatpush.msrb.mxu1 %v417_v47  ;;  %v438_v47 = vld [vmem:[#allocation8 + $0x108] sm:$0xff] }
  0x57   :  { %342 = vmatpush.msrb.mxu2 %v180_v26  ;;  %v450_v26 = vld [vmem:[#allocation8 + $0x168] sm:$0xff] }
  0x58   :  { %343 = vmatmul.f32.vlgmr.msrb.gmra.mxu2 %v1458_v62  ;;  %362 = vmatpush.msrb.mxu0 %v212_v28  ;;  %v465_v62 = vld [vmem:[#allocation8 + $0x1e0] sm:$0xff]  ;;  %v447_v28 = vld [vmem:[#allocation8 + $0x150] sm:$0xff] }
  0x59   :  { %1089 = vmatmul.msk.f32.vlgmr.msrb.gmra.mxu0 %vm243_vm0, %v1454_v48  ;;  %v418_v48 = vld [vmem:[#allocation8 + $0x68] sm:$0xff]  ;;  %485 = vmatpush.msrb.mxu1 %v415_v50 }
  0x5a   :  { %515 = vmatpush.msra.mxu0 %v436_v30  ;;  %535 = vmatpush.msra.mxu2 %v468_v56  ;;  %v445_v30 = vld [vmem:[#allocation8 + $0x140] sm:$0xff] }
  0x5b   :  { %486 = vmatpush.msrb.mxu1 %v413_v53  ;;  %496 = vmatpush.msrb.mxu3 %v465_v62 }
  0x5c   :  { %516 = vmatpush.msra.mxu0 %v434_v32  ;;  %536 = vmatpush.msra.mxu2 %v466_v63  ;;  %v443_v32 = vld [vmem:[#allocation8 + $0x130] sm:$0xff] }
  0x5d   :  { %487 = vmatpush.msrb.mxu1 %v411_v58  ;;  %497 = vmatpush.msrb.mxu3 %v463_v4 }
  0x5e   :  { %517 = vmatpush.msra.mxu0 %v432_v34  ;;  %537 = vmatpush.msra.mxu2 %v464_v5  ;;  %v240_v34 = vperm.slane %v1464_v49, 1 }
  0x5f   :  { %488 = vmatpush.msrb.mxu1 %v409_v1  ;;  %498 = vmatpush.msrb.mxu3 %v461_v9  ;;  %v656_v9 = vld [vmem:[#allocation10 + $0x1f8] sm:$0xff] }
  0x60   :  { %518 = vmatpush.msra.mxu0 %v430_v36  ;;  %538 = vmatpush.msra.mxu2 %v462_v10  ;;  %v442_v36 = vld [vmem:[#allocation8 + $0x128] sm:$0xff]  ;;  %v621_v10 = vld [vmem:[#allocation10 + $0xe0] sm:$0xff] }
  0x61   :  { %489 = vmatpush.msrb.mxu1 %v407_v6  ;;  %499 = vmatpush.msrb.mxu3 %v459_v14  ;;  %v623_v6 = vld [vmem:[#allocation10 + $0xf0] sm:$0xff] }
  0x62   :  { %519 = vmatpush.msra.mxu0 %v428_v38  ;;  %539 = vmatpush.msra.mxu2 %v460_v15  ;;  %v619_v14 = vld [vmem:[#allocation10 + $0xd0] sm:$0xff] }
  0x63   :  { %490 = vmatpush.msrb.mxu1 %v405_v11  ;;  %500 = vmatpush.msrb.mxu3 %v457_v16  ;;  %v653_v11 = vld [vmem:[#allocation10 + $0x1e0] sm:$0xff]  ;;  %v651_v15 = vld [vmem:[#allocation10 + $0x1d0] sm:$0xff]  ;;  %v620_v16 = vld [vmem:[#allocation10 + $0xd8] sm:$0xff] }
  0x64   :  { %520 = vmatpush.msra.mxu0 %v426_v40  ;;  %540 = vmatpush.msra.mxu2 %v458_v17  ;;  %v439_v40 = vld [vmem:[#allocation8 + $0x110] sm:$0xff]  ;;  %v652_v17 = vld [vmem:[#allocation10 + $0x1d8] sm:$0xff] }
  0x65   :  { %501 = vmatpush.msrb.mxu3 %v455_v18  ;;  %663 = vmatpush.msra.mxu1 %v623_v6  ;;  %v617_v18 = vld [vmem:[#allocation10 + $0xc0] sm:$0xff] }
  0x66   :  { %521 = vmatpush.msra.mxu0 %v424_v42  ;;  %541 = vmatpush.msra.mxu2 %v456_v19  ;;  %v649_v19 = vld [vmem:[#allocation10 + $0x1c0] sm:$0xff] }
  0x67   :  { %502 = vmatpush.msrb.mxu3 %v453_v20  ;;  %664 = vmatpush.msra.mxu1 %v621_v10  ;;  %v618_v20 = vld [vmem:[#allocation10 + $0xc8] sm:$0xff] }
  0x68   :  { %522 = vmatpush.msra.mxu0 %v422_v44  ;;  %542 = vmatpush.msra.mxu2 %v454_v21  ;;  %v650_v21 = vld [vmem:[#allocation10 + $0x1c8] sm:$0xff] }
  0x69   :  { %503 = vmatpush.msrb.mxu3 %v451_v22  ;;  %665 = vmatpush.msra.mxu1 %v619_v14  ;;  %v615_v22 = vld [vmem:[#allocation10 + $0xb0] sm:$0xff]  ;;  %v626_v10 = vld [vmem:[#allocation10 + $0x108] sm:$0xff] }
  0x6a   :  { %523 = vmatpush.msra.mxu0 %v420_v46  ;;  %543 = vmatpush.msra.mxu2 %v452_v23  ;;  %v437_v46 = vld [vmem:[#allocation8 + $0x100] sm:$0xff]  ;;  %v647_v23 = vld [vmem:[#allocation10 + $0x1b0] sm:$0xff] }
  0x6b   :  { %504 = vmatpush.msrb.mxu3 %v449_v25  ;;  %666 = vmatpush.msra.mxu1 %v617_v18  ;;  %v648_v25 = vld [vmem:[#allocation10 + $0x1b8] sm:$0xff] }
  0x6c   :  { %524 = vmatpush.msra.mxu0 %v418_v48  ;;  %544 = vmatpush.msra.mxu2 %v450_v26  ;;  %v613_v26 = vld [vmem:[#allocation10 + $0xa0] sm:$0xff] }
  0x6d   :  { %505 = vmatpush.msrb.mxu3 %v447_v28  ;;  %667 = vmatpush.msra.mxu1 %v615_v22  ;;  %v614_v28 = vld [vmem:[#allocation10 + $0xa8] sm:$0xff] }
  0x6e   :  { %525 = vmatpush.msra.mxu0 %v416_v51  ;;  %545 = vmatpush.msra.mxu2 %v448_v29  ;;  %v646_v29 = vld [vmem:[#allocation10 + $0x1a8] sm:$0xff] }
  0x6f   :  { %506 = vmatpush.msrb.mxu3 %v445_v30  ;;  %668 = vmatpush.msra.mxu1 %v613_v26  ;;  %v611_v30 = vld [vmem:[#allocation10 + $0x90] sm:$0xff] }
  0x70   :  { %526 = vmatpush.msra.mxu0 %v414_v54  ;;  %546 = vmatpush.msra.mxu2 %v446_v31  ;;  %v643_v31 = vld [vmem:[#allocation10 + $0x190] sm:$0xff] }
  0x71   :  { %507 = vmatpush.msrb.mxu3 %v443_v32  ;;  %v612_v32 = vld [vmem:[#allocation10 + $0x98] sm:$0xff]  ;;  %669 = vmatpush.msra.mxu1 %v611_v30 }
  0x72   :  { %527 = vmatpush.msra.mxu0 %v412_v59  ;;  %547 = vmatpush.msra.mxu2 %v444_v33  ;;  %v644_v33 = vld [vmem:[#allocation10 + $0x198] sm:$0xff] }
  0x73   :  { %508 = vmatpush.msrb.mxu3 %v441_v35  ;;  %v641_v35 = vld [vmem:[#allocation10 + $0x180] sm:$0xff] }
  0x74   :  { %528 = vmatpush.msra.mxu0 %v410_v2  ;;  %548 = vmatpush.msra.mxu2 %v442_v36  ;;  %v610_v36 = vld [vmem:[#allocation10 + $0x88] sm:$0xff] }
  0x75   :  { %509 = vmatpush.msrb.mxu3 %v439_v40  ;;  %v608_v40 = vld [vmem:[#allocation10 + $0x78] sm:$0xff] }
  0x76   :  { %529 = vmatpush.msra.mxu0 %v408_v7  ;;  %549 = vmatpush.msra.mxu2 %v440_v41  ;;  %v655_v7 = vld [vmem:[#allocation10 + $0x1f0] sm:$0xff]  ;;  %v640_v41 = vld [vmem:[#allocation10 + $0x178] sm:$0xff] }
  0x77   :  { %510 = vmatpush.msrb.mxu3 %v437_v46  ;;  %v603_v46 = vld [vmem:[#allocation10 + $0x50] sm:$0xff] }
  0x78   :  { %530 = vmatpush.msra.mxu0 %v406_v12  ;;  %550 = vmatpush.msra.mxu2 %v438_v47  ;;  %v622_v12 = vld [vmem:[#allocation10 + $0xe8] sm:$0xff]  ;;  %v635_v47 = vld [vmem:[#allocation10 + $0x150] sm:$0xff] }
  0x79   :  { %683 = vmatpush.msra.mxu3 %v655_v7  ;;  %v593_v7 = vld [vmem:[#allocation10] sm:$0xff] }
  0x7a   :  { %723 = vmatpush.msrb.mxu2 %v656_v9  ;;  %v594_v9 = vld [vmem:[#allocation10 + $0x8] sm:$0xff] }
  0x7b   :  { %684 = vmatpush.msra.mxu3 %v653_v11 }
  0x7d   :  { %685 = vmatpush.msra.mxu3 %v651_v15 }
  0x7f   :  { %686 = vmatpush.msra.mxu3 %v649_v19 }
  0x81   :  { %687 = vmatpush.msra.mxu3 %v647_v23 }
  0xbb   :  { %v304_v0 = vpop.f32.mrf.mxu2 }
  0xbc   :  { %v264_v57 = vpop.f32.mrf.mxu0 }
  0xbd   :  { %v265_v60 = vadd.f32 %v264_v57, %v239_v52 }
  0xbe   :  { %v284_v61 = vpop.f32.mrf.mxu1 }
  0xbf   :  { %v285_v3 = vadd.f32 %v284_v61, %v265_v60 }
  0xc1   :  { %v305_v8 = vadd.f32 %v304_v0, %v285_v3 }
  0xc3   :  { %v1090_v13 = vmul.f32 -1.442695, %v305_v8  ;;  %v624_v8 = vld [vmem:[#allocation10 + $0xf8] sm:$0xff] }
  0xc4   :  { %703 = vmatpush.msrb.mxu0 %v624_v8  ;;  %v625_v8 = vld [vmem:[#allocation10 + $0x100] sm:$0xff] }
  0xc5   :  { %1111 = vpow2.f32 %v1090_v13  ;;  %v654_v13 = vld [vmem:[#allocation10 + $0x1e8] sm:$0xff] }
  0xc6   :  { %v324_v38 = vpop.f32.mrf.mxu3  ;;  %704 = vmatpush.msrb.mxu0 %v622_v12  ;;  %724 = vmatpush.msrb.mxu2 %v654_v13 }
  0xc7   :  { %v325_v43 = vadd.f32 %v324_v38, %v240_v34  ;;  %v609_v34 = vld [vmem:[#allocation10 + $0x80] sm:$0xff]  ;;  %v607_v38 = vld [vmem:[#allocation10 + $0x70] sm:$0xff] }
  0xc8   :  { %705 = vmatpush.msrb.mxu0 %v620_v16  ;;  %725 = vmatpush.msrb.mxu2 %v652_v17 }
  0xc9   :  { %670 = vmatpush.msra.mxu1 %v609_v34 }
  0xca   :  { %706 = vmatpush.msrb.mxu0 %v618_v20  ;;  %726 = vmatpush.msrb.mxu2 %v650_v21 }
  0xcb   :  { %v1112_v24 = vpop.eup %1111  ;;  %671 = vmatpush.msra.mxu1 %v607_v38 }
  0xcc   :  { %v373_v27 = vadd.f32 1.0, %v1112_v24  ;;  %v616_v24 = vld [vmem:[#allocation10 + $0xb8] sm:$0xff]  ;;  %727 = vmatpush.msrb.mxu2 %v648_v25 }
  0xcd   :  { %707 = vmatpush.msrb.mxu0 %v616_v24 }
  0xce   :  { %1113 = vrcp.f32 %v373_v27  ;;  %vm380_vm1 = vweird.f32 %v373_v27  ;;  %v386_v42 = vand.u32 2147483648, %v373_v27  ;;  %v384_v45 = vand.u32 2147483647, %v373_v27  ;;  %728 = vmatpush.msrb.mxu2 %v646_v29 }
  0xcf   :  { %708 = vmatpush.msrb.mxu0 %v614_v28 }
  0xd0   :  { %v387_v51 = vor.u32 1.1754944e-38, %v386_v42  ;;  %vm385_vm4 = vcmp.eq.f32.partialorder %v384_v45, 8.507059e+37  ;;  %729 = vmatpush.msrb.mxu2 %v644_v33  ;;  %v605_v42 = vld [vmem:[#allocation10 + $0x60] sm:$0xff]  ;;  %v638_v45 = vld [vmem:[#allocation10 + $0x168] sm:$0xff] }
  0xd1   :  { %709 = vmatpush.msrb.mxu0 %v612_v32  ;;  %672 = vmatpush.msra.mxu1 %v605_v42 }
  0xd3   :  { %710 = vmatpush.msrb.mxu0 %v610_v36  ;;  %673 = vmatpush.msra.mxu1 %v603_v46  ;;  %v844_v46 = vld [vmem:[#allocation11 + $0x1f8] sm:$0xff] }
  0xd4   :  { %v1114_v37 = vpop.eup %1113 }
  0xd5   :  { %v376_v39 = vmul.f32 %v1114_v37, %v373_v27  ;;  %vm381_vm2 = vweird.f32 %v1114_v37  ;;  %v645_v27 = vld [vmem:[#allocation10 + $0x1a0] sm:$0xff]  ;;  %711 = vmatpush.msrb.mxu0 %v608_v40 }
  0xd6   :  { %v364_v50 = vpop.f32.mrf.mxu0  ;;  %vm382_vm3 = vmor %vm380_vm1, %vm381_vm2  ;;  %688 = vmatpush.msra.mxu3 %v645_v27 }
  0xd7   :  { %v377_v44 = vsub.f32 1.0, %v376_v39  ;;  %v639_v39 = vld [vmem:[#allocation10 + $0x170] sm:$0xff] }
  0xd8   :  { %689 = vmatpush.msra.mxu3 %v643_v31 }
  0xd9   :  { %v378_v48 = vmul.f32 %v1114_v37, %v377_v44  ;;  %v606_v44 = vld [vmem:[#allocation10 + $0x68] sm:$0xff] }
  0xda   :  { %690 = vmatpush.msra.mxu3 %v641_v35  ;;  %712 = vmatpush.msrb.mxu0 %v606_v44  ;;  %v843_v44 = vld [vmem:[#allocation11 + $0x1f0] sm:$0xff] }
  0xdb   :  { %v344_v49 = vpop.f32.mrf.mxu2  ;;  %v379_v53 = vadd.f32 %v1114_v37, %v378_v48  ;;  %v604_v48 = vld [vmem:[#allocation10 + $0x58] sm:$0xff] }
  0xdc   :  { %v345_v52 = vadd.f32 %v344_v49, %v325_v43  ;;  %691 = vmatpush.msra.mxu3 %v639_v39  ;;  %v637_v43 = vld [vmem:[#allocation10 + $0x160] sm:$0xff]  ;;  %v636_v49 = vld [vmem:[#allocation10 + $0x158] sm:$0xff]  ;;  %713 = vmatpush.msrb.mxu0 %v604_v48 }
  0xdd   :  { %v383_v55 = vsel %vm382_vm3, %v1114_v37, %v379_v53  ;;  %v642_v37 = vld [vmem:[#allocation10 + $0x188] sm:$0xff]  ;;  %v841_v48 = vld [vmem:[#allocation11 + $0x1e0] sm:$0xff] }
  0xde   :  { %v365_v54 = vadd.f32 %v364_v50, %v345_v52  ;;  %v388_v56 = vsel %vm385_vm4, %v387_v51, %v383_v55  ;;  %730 = vmatpush.msrb.mxu2 %v642_v37  ;;  %692 = vmatpush.msra.mxu3 %v637_v43  ;;  %v601_v50 = vld [vmem:[#allocation10 + $0x40] sm:$0xff]  ;;  %v602_v52 = vld [vmem:[#allocation10 + $0x48] sm:$0xff]  ;;  %v631_v55 = vld [vmem:[#allocation10 + $0x130] sm:$0xff] }
  0xdf   :  { %491 = vmatmul.f32.vlgmr.msrb.gmra.mxu1 %v388_v56  ;;  %531 = vmatmul.f32.vlgmr.msra.gmra.mxu0 %v388_v56  ;;  %v633_v51 = vld [vmem:[#allocation10 + $0x140] sm:$0xff]  ;;  %v634_v53 = vld [vmem:[#allocation10 + $0x148] sm:$0xff]  ;;  %v600_v56 = vld [vmem:[#allocation10 + $0x38] sm:$0xff] }
  0xe0   :  { %v1091_v57 = vmul.f32 -1.442695, %v365_v54  ;;  %731 = vmatpush.msrb.mxu2 %v640_v41  ;;  %693 = vmatpush.msra.mxu3 %v635_v47  ;;  %v599_v54 = vld [vmem:[#allocation10 + $0x30] sm:$0xff]  ;;  %v809_v47 = vld [vmem:[#allocation11 + $0xe0] sm:$0xff] }
  0xe1   :  { %674 = vmatpush.msra.mxu1 %v601_v50  ;;  %714 = vmatpush.msrb.mxu0 %v602_v52  ;;  %v811_v43 = vld [vmem:[#allocation11 + $0xf0] sm:$0xff]  ;;  %v842_v50 = vld [vmem:[#allocation11 + $0x1e8] sm:$0xff] }
  0xe2   :  { %1115 = vpow2.f32 %v1091_v57  ;;  %732 = vmatpush.msrb.mxu2 %v638_v45  ;;  %694 = vmatpush.msra.mxu3 %v633_v51  ;;  %v632_v57 = vld [vmem:[#allocation10 + $0x138] sm:$0xff]  ;;  %v807_v51 = vld [vmem:[#allocation11 + $0xd0] sm:$0xff] }
  0xe3   :  { %675 = vmatpush.msra.mxu1 %v599_v54  ;;  %715 = vmatpush.msrb.mxu0 %v600_v56  ;;  %v812_v45 = vld [vmem:[#allocation11 + $0xf8] sm:$0xff]  ;;  %v839_v52 = vld [vmem:[#allocation11 + $0x1d0] sm:$0xff]  ;;  %v837_v56 = vld [vmem:[#allocation11 + $0x1c0] sm:$0xff] }
  0xe4   :  { %733 = vmatpush.msrb.mxu2 %v636_v49  ;;  %695 = vmatpush.msra.mxu3 %v631_v55  ;;  %v810_v49 = vld [vmem:[#allocation11 + $0xe8] sm:$0xff]  ;;  %v840_v54 = vld [vmem:[#allocation11 + $0x1d8] sm:$0xff]  ;;  %v805_v55 = vld [vmem:[#allocation11 + $0xc0] sm:$0xff] }
  0xe6   :  { %734 = vmatpush.msrb.mxu2 %v634_v53  ;;  %v808_v53 = vld [vmem:[#allocation11 + $0xd8] sm:$0xff] }
  0xe8   :  { %v1116_v58 = vpop.eup %1115  ;;  %735 = vmatpush.msrb.mxu2 %v632_v57  ;;  %v806_v57 = vld [vmem:[#allocation11 + $0xc8] sm:$0xff] }
  0xe9   :  { %v374_v59 = vadd.f32 1.0, %v1116_v58  ;;  %v469_v58 = vld [vmem:[%s1488_s4] sm:$0x3] }
  0xeb   :  { %1117 = vrcp.f32 %v374_v59  ;;  %v401_v63 = vand.u32 2147483648, %v374_v59  ;;  %v399_v1 = vand.u32 2147483647, %v374_v59  ;;  %vm395_vm6 = vweird.f32 %v374_v59 }
  0xed   :  { %v402_v3 = vor.u32 1.1754944e-38, %v401_v63  ;;  %vm400_vm8 = vcmp.eq.f32.partialorder %v399_v1, 8.507059e+37  ;;  %v595_v63 = vld [vmem:[#allocation10 + $0x10] sm:$0xff]  ;;  %v471_v1 = vperm.slane %v469_v58, 0 }
  0xf1   :  { %v1118_v60 = vpop.eup %1117 }
  0xf2   :  { %v391_v61 = vmul.f32 %v1118_v60, %v374_v59  ;;  %vm396_vm5 = vweird.f32 %v1118_v60  ;;  %v597_v59 = vld [vmem:[#allocation10 + $0x20] sm:$0xff] }
  0xf3   :  { %vm397_vm7 = vmor %vm395_vm6, %vm396_vm5  ;;  %676 = vmatpush.msra.mxu1 %v597_v59  ;;  %v803_v59 = vld [vmem:[#allocation11 + $0xb0] sm:$0xff] }
  0xf4   :  { %v392_v62 = vsub.f32 1.0, %v391_v61  ;;  %v598_v61 = vld [vmem:[#allocation10 + $0x28] sm:$0xff] }
  0xf5   :  { %716 = vmatpush.msrb.mxu0 %v598_v61  ;;  %677 = vmatpush.msra.mxu1 %v595_v63  ;;  %v804_v61 = vld [vmem:[#allocation11 + $0xb8] sm:$0xff]  ;;  %v801_v63 = vld [vmem:[#allocation11 + $0xa0] sm:$0xff] }
  0xf6   :  { %v393_v0 = vmul.f32 %v1118_v60, %v392_v62  ;;  %v630_v62 = vld [vmem:[#allocation10 + $0x128] sm:$0xff] }
  0xf7   :  { %736 = vmatpush.msrb.mxu2 %v630_v62  ;;  %678 = vmatpush.msra.mxu1 %v593_v7  ;;  %v836_v62 = vld [vmem:[#allocation11 + $0x1b8] sm:$0xff]  ;;  %v797_v7 = vld [vmem:[#allocation11 + $0x80] sm:$0xff] }
  0xf8   :  { %v394_v2 = vadd.f32 %v1118_v60, %v393_v0  ;;  %v627_v0 = vld [vmem:[#allocation10 + $0x110] sm:$0xff] }
  0xf9   :  { %851 = vmatpush.msrb.mxu1 %v811_v43 }
  0xfa   :  { %v398_v4 = vsel %vm397_vm7, %v1118_v60, %v394_v2  ;;  %v629_v60 = vld [vmem:[#allocation10 + $0x120] sm:$0xff]  ;;  %v472_v2 = vperm.slane %v469_v58, 1  ;;  %v838_v58 = vld [vmem:[#allocation11 + $0x1c8] sm:$0xff] }
  0xfb   :  { %v403_v5 = vsel %vm400_vm8, %v402_v3, %v398_v4  ;;  %696 = vmatpush.msra.mxu3 %v629_v60  ;;  %v596_v3 = vld [vmem:[#allocation10 + $0x18] sm:$0xff]  ;;  %852 = vmatpush.msrb.mxu1 %v809_v47  ;;  %v835_v60 = vld [vmem:[#allocation11 + $0x1b0] sm:$0xff]  ;;  %v814_v47 = vld [vmem:[#allocation11 + $0x108] sm:$0xff] }
  0xfc   :  { %511 = vmatmul.f32.vlgmr.msrb.gmra.mxu3 %v403_v5  ;;  %551 = vmatmul.f32.vlgmr.msra.gmra.mxu2 %v403_v5  ;;  %v628_v4 = vld [vmem:[#allocation10 + $0x118] sm:$0xff] }
  0xfd   :  { %697 = vmatpush.msra.mxu3 %v627_v0  ;;  %717 = vmatpush.msrb.mxu0 %v596_v3  ;;  %v833_v0 = vld [vmem:[#allocation11 + $0x1a0] sm:$0xff]  ;;  %v799_v3 = vld [vmem:[#allocation11 + $0x90] sm:$0xff] }
  0xfe   :  { %737 = vmatpush.msrb.mxu2 %v628_v4  ;;  %853 = vmatpush.msrb.mxu1 %v807_v51  ;;  %v831_v4 = vld [vmem:[#allocation11 + $0x190] sm:$0xff] }
  0xff   :  { %698 = vmatpush.msra.mxu3 %v625_v8  ;;  %718 = vmatpush.msrb.mxu0 %v594_v9  ;;  %v829_v8 = vld [vmem:[#allocation11 + $0x180] sm:$0xff]  ;;  %v798_v9 = vld [vmem:[#allocation11 + $0x88] sm:$0xff] }
 0x100   :  { %738 = vmatpush.msrb.mxu2 %v626_v10  ;;  %854 = vmatpush.msrb.mxu1 %v805_v55  ;;  %v830_v10 = vld [vmem:[#allocation11 + $0x188] sm:$0xff] }
 0x101   :  { %871 = vmatpush.msrb.mxu3 %v843_v44  ;;  %891 = vmatpush.msra.mxu0 %v812_v45  ;;  %v781_v44 = vld [vmem:[#allocation11] sm:$0xff] }
 0x102   :  { %911 = vmatpush.msra.mxu2 %v844_v46  ;;  %855 = vmatpush.msrb.mxu1 %v803_v59  ;;  %v813_v45 = vld [vmem:[#allocation11 + $0x100] sm:$0xff]  ;;  %v782_v46 = vld [vmem:[#allocation11 + $0x8] sm:$0xff] }
 0x103   :  { %872 = vmatpush.msrb.mxu3 %v841_v48  ;;  %892 = vmatpush.msra.mxu0 %v810_v49 }
 0x104   :  { %912 = vmatpush.msra.mxu2 %v842_v50  ;;  %856 = vmatpush.msrb.mxu1 %v801_v63 }
 0x105   :  { %873 = vmatpush.msrb.mxu3 %v839_v52  ;;  %893 = vmatpush.msra.mxu0 %v808_v53 }
 0x106   :  { %913 = vmatpush.msra.mxu2 %v840_v54  ;;  %857 = vmatpush.msrb.mxu1 %v799_v3 }
 0x107   :  { %874 = vmatpush.msrb.mxu3 %v837_v56  ;;  %894 = vmatpush.msra.mxu0 %v806_v57 }
 0x108   :  { %914 = vmatpush.msra.mxu2 %v838_v58  ;;  %858 = vmatpush.msrb.mxu1 %v797_v7 }
 0x109   :  { %875 = vmatpush.msrb.mxu3 %v835_v60  ;;  %895 = vmatpush.msra.mxu0 %v804_v61 }
 0x10a   :  { %915 = vmatpush.msra.mxu2 %v836_v62 }
 0x10b   :  { %876 = vmatpush.msrb.mxu3 %v833_v0 }
 0x10d   :  { %877 = vmatpush.msrb.mxu3 %v831_v4 }
 0x10f   :  { %878 = vmatpush.msrb.mxu3 %v829_v8 }
 0x15c   :  { %v492_v5 = vpop.f32.mrf.mxu1  ;;  %v532_v6 = vpop.f32.mrf.mxu0 }
 0x15d   :  { %v493_v11 = vadd.f32 %v492_v5, %v471_v1  ;;  %v533_v12 = vadd.f32 %v532_v6, %v472_v2  ;;  %v802_v1 = vld [vmem:[#allocation11 + $0xa8] sm:$0xff]  ;;  %v800_v5 = vld [vmem:[#allocation11 + $0x98] sm:$0xff] }
 0x15e   :  { %v834_v2 = vld [vmem:[#allocation11 + $0x1a8] sm:$0xff]  ;;  %896 = vmatpush.msra.mxu0 %v802_v1  ;;  %v832_v6 = vld [vmem:[#allocation11 + $0x198] sm:$0xff] }
 0x15f   :  { %916 = vmatpush.msra.mxu2 %v834_v2 }
 0x160   :  { %897 = vmatpush.msra.mxu0 %v800_v5 }
 0x161   :  { %917 = vmatpush.msra.mxu2 %v832_v6 }
 0x162   :  { %898 = vmatpush.msra.mxu0 %v798_v9 }
 0x163   :  { %918 = vmatpush.msra.mxu2 %v830_v10 }
 0x17f   :  { %v512_v13 = vpop.f32.mrf.mxu3  ;;  %v552_v14 = vpop.f32.mrf.mxu2 }
 0x180   :  { %v513_v15 = vadd.f32 %v512_v13, %v493_v11  ;;  %v553_v16 = vadd.f32 %v552_v14, %v533_v12  ;;  %v795_v11 = vld [vmem:[#allocation11 + $0x70] sm:$0xff]  ;;  %v796_v13 = vld [vmem:[#allocation11 + $0x78] sm:$0xff] }
 0x181   :  { %v827_v12 = vld [vmem:[#allocation11 + $0x170] sm:$0xff]  ;;  %v828_v14 = vld [vmem:[#allocation11 + $0x178] sm:$0xff]  ;;  %859 = vmatpush.msrb.mxu1 %v795_v11  ;;  %899 = vmatpush.msra.mxu0 %v796_v13 }
 0x182   :  { %v1092_v17 = vmul.f32 -1.442695, %v513_v15  ;;  %v1093_v18 = vmul.f32 -1.442695, %v553_v16  ;;  %v793_v15 = vld [vmem:[#allocation11 + $0x60] sm:$0xff]  ;;  %879 = vmatpush.msrb.mxu3 %v827_v12  ;;  %919 = vmatpush.msra.mxu2 %v828_v14 }
 0x183   :  { %v825_v16 = vld [vmem:[#allocation11 + $0x160] sm:$0xff]  ;;  %860 = vmatpush.msrb.mxu1 %v793_v15 }
 0x184   :  { %1119 = vpow2.f32 %v1092_v17  ;;  %v794_v17 = vld [vmem:[#allocation11 + $0x68] sm:$0xff]  ;;  %880 = vmatpush.msrb.mxu3 %v825_v16  ;;  %v984_v16 = vld [vmem:[#allocation13 + $0x78] sm:$0xff] }
 0x185   :  { %1121 = vpow2.f32 %v1093_v18  ;;  %v826_v18 = vld [vmem:[#allocation11 + $0x168] sm:$0xff]  ;;  %900 = vmatpush.msra.mxu0 %v794_v17  ;;  %v1000_v17 = vld [vmem:[#allocation13 + $0xf8] sm:$0xff] }
 0x186   :  { %920 = vmatpush.msra.mxu2 %v826_v18  ;;  %v983_v18 = vld [vmem:[#allocation13 + $0x70] sm:$0xff] }
 0x18a   :  { %v1120_v19 = vpop.eup %1119 }
 0x18b   :  { %v1122_v20 = vpop.eup %1121  ;;  %v561_v21 = vadd.f32 1.0, %v1120_v19  ;;  %v791_v19 = vld [vmem:[#allocation11 + $0x50] sm:$0xff] }
 0x18c   :  { %v562_v22 = vadd.f32 1.0, %v1122_v20  ;;  %v823_v20 = vld [vmem:[#allocation11 + $0x150] sm:$0xff]  ;;  %861 = vmatpush.msrb.mxu1 %v791_v19 }
 0x18d   :  { %1123 = vrcp.f32 %v561_v21  ;;  %v574_v28 = vand.u32 2147483648, %v561_v21  ;;  %v572_v31 = vand.u32 2147483647, %v561_v21  ;;  %vm568_vm11 = vweird.f32 %v561_v21  ;;  %881 = vmatpush.msrb.mxu3 %v823_v20  ;;  %v999_v19 = vld [vmem:[#allocation13 + $0xf0] sm:$0xff]  ;;  %v982_v20 = vld [vmem:[#allocation13 + $0x68] sm:$0xff] }
 0x18e   :  { %1125 = vrcp.f32 %v562_v22  ;;  %v589_v32 = vand.u32 2147483648, %v562_v22  ;;  %v587_v34 = vand.u32 2147483647, %v562_v22  ;;  %vm583_vm13 = vweird.f32 %v562_v22 }
 0x18f   :  { %v575_v36 = vor.u32 1.1754944e-38, %v574_v28  ;;  %vm573_vm14 = vcmp.eq.f32.partialorder %v572_v31, 8.507059e+37  ;;  %v819_v28 = vld [vmem:[#allocation11 + $0x130] sm:$0xff] }
 0x190   :  { %v590_v39 = vor.u32 1.1754944e-38, %v589_v32  ;;  %vm588_vm0 = vcmp.eq.f32.partialorder %v587_v34, 8.507059e+37  ;;  %v657_v31 = vld [vmem:[%s1490_s6] sm:$0x3]  ;;  %v785_v32 = vld [vmem:[#allocation11 + $0x20] sm:$0xff]  ;;  %v786_v34 = vld [vmem:[#allocation11 + $0x28] sm:$0xff] }
 0x193   :  { %v1124_v23 = vpop.eup %1123 }
 0x194   :  { %v1126_v24 = vpop.eup %1125  ;;  %v564_v25 = vmul.f32 %v1124_v23, %v561_v21  ;;  %vm569_vm9 = vweird.f32 %v1124_v23  ;;  %v792_v21 = vld [vmem:[#allocation11 + $0x58] sm:$0xff] }
 0x195   :  { %v579_v26 = vmul.f32 %v1126_v24, %v562_v22  ;;  %vm584_vm10 = vweird.f32 %v1126_v24  ;;  %vm570_vm12 = vmor %vm568_vm11, %vm569_vm9  ;;  %v824_v22 = vld [vmem:[#allocation11 + $0x158] sm:$0xff]  ;;  %901 = vmatpush.msra.mxu0 %v792_v21  ;;  %v998_v21 = vld [vmem:[#allocation13 + $0xe8] sm:$0xff] }
 0x196   :  { %v565_v27 = vsub.f32 1.0, %v564_v25  ;;  %vm585_vm15 = vmor %vm583_vm13, %vm584_vm10  ;;  %v790_v25 = vld [vmem:[#allocation11 + $0x48] sm:$0xff]  ;;  %921 = vmatpush.msra.mxu2 %v824_v22  ;;  %v981_v22 = vld [vmem:[#allocation13 + $0x60] sm:$0xff] }
 0x197   :  { %v580_v29 = vsub.f32 1.0, %v579_v26  ;;  %v822_v26 = vld [vmem:[#allocation11 + $0x148] sm:$0xff]  ;;  %902 = vmatpush.msra.mxu0 %v790_v25  ;;  %v996_v25 = vld [vmem:[#allocation13 + $0xd8] sm:$0xff] }
 0x198   :  { %v566_v30 = vmul.f32 %v1124_v23, %v565_v27  ;;  %v787_v27 = vld [vmem:[#allocation11 + $0x30] sm:$0xff]  ;;  %922 = vmatpush.msra.mxu2 %v822_v26 }
 0x199   :  { %v581_v33 = vmul.f32 %v1126_v24, %v580_v29  ;;  %v788_v29 = vld [vmem:[#allocation11 + $0x38] sm:$0xff]  ;;  %v979_v26 = vld [vmem:[#allocation13 + $0x50] sm:$0xff] }
 0x19a   :  { %v567_v35 = vadd.f32 %v1124_v23, %v566_v30  ;;  %v820_v30 = vld [vmem:[#allocation11 + $0x138] sm:$0xff]  ;;  %903 = vmatpush.msra.mxu0 %v788_v29  ;;  %v994_v29 = vld [vmem:[#allocation13 + $0xc8] sm:$0xff] }
 0x19b   :  { %v582_v37 = vadd.f32 %v1126_v24, %v581_v33  ;;  %v817_v33 = vld [vmem:[#allocation11 + $0x120] sm:$0xff]  ;;  %923 = vmatpush.msra.mxu2 %v820_v30 }
 0x19c   :  { %v571_v38 = vsel %vm570_vm12, %v1124_v23, %v567_v35  ;;  %v789_v23 = vld [vmem:[#allocation11 + $0x40] sm:$0xff]  ;;  %v818_v35 = vld [vmem:[#allocation11 + $0x128] sm:$0xff]  ;;  %904 = vmatpush.msra.mxu0 %v786_v34  ;;  %v975_v34 = vld [vmem:[#allocation13 + $0x30] sm:$0xff] }
 0x19d   :  { %v576_v40 = vsel %vm573_vm14, %v575_v36, %v571_v38  ;;  %v586_v41 = vsel %vm585_vm15, %v1126_v24, %v582_v37  ;;  %v821_v24 = vld [vmem:[#allocation11 + $0x140] sm:$0xff]  ;;  %862 = vmatpush.msrb.mxu1 %v789_v23  ;;  %v783_v36 = vld [vmem:[#allocation11 + $0x10] sm:$0xff]  ;;  %v659_v38 = vperm.slane %v657_v31, 0  ;;  %924 = vmatpush.msra.mxu2 %v818_v35 }
 0x19e   :  { %679 = vmatmul.f32.vlgmr.msra.gmra.mxu1 %v576_v40  ;;  %v591_v42 = vsel %vm588_vm0, %v590_v39, %v586_v41  ;;  %719 = vmatmul.f32.vlgmr.msrb.gmra.mxu0 %v576_v40  ;;  %v815_v37 = vld [vmem:[#allocation11 + $0x110] sm:$0xff]  ;;  %v660_v39 = vperm.slane %v657_v31, 1  ;;  %v784_v40 = vld [vmem:[#allocation11 + $0x18] sm:$0xff]  ;;  %v997_v23 = vld [vmem:[#allocation13 + $0xe0] sm:$0xff] }
 0x19f   :  { %699 = vmatmul.f32.vlgmr.msra.gmra.mxu3 %v591_v42  ;;  %739 = vmatmul.f32.vlgmr.msrb.gmra.mxu2 %v591_v42  ;;  %v816_v41 = vld [vmem:[#allocation11 + $0x118] sm:$0xff]  ;;  %v977_v30 = vld [vmem:[#allocation13 + $0x40] sm:$0xff]  ;;  %v991_v35 = vld [vmem:[#allocation13 + $0xb0] sm:$0xff] }
 0x1a0   :  { %882 = vmatpush.msrb.mxu3 %v821_v24  ;;  %863 = vmatpush.msrb.mxu1 %v787_v27  ;;  %v980_v24 = vld [vmem:[#allocation13 + $0x58] sm:$0xff]  ;;  %v995_v27 = vld [vmem:[#allocation13 + $0xd0] sm:$0xff]  ;;  %v993_v31 = vld [vmem:[#allocation13 + $0xc0] sm:$0xff] }
 0x1a1   :  { %905 = vmatpush.msra.mxu0 %v784_v40  ;;  %925 = vmatpush.msra.mxu2 %v816_v41  ;;  %v972_v40 = vld [vmem:[#allocation13 + $0x18] sm:$0xff] }
 0x1a2   :  { %883 = vmatpush.msrb.mxu3 %v819_v28  ;;  %864 = vmatpush.msrb.mxu1 %v785_v32  ;;  %v978_v28 = vld [vmem:[#allocation13 + $0x48] sm:$0xff]  ;;  %v976_v32 = vld [vmem:[#allocation13 + $0x38] sm:$0xff] }
 0x1a3   :  { %906 = vmatpush.msra.mxu0 %v782_v46  ;;  %926 = vmatpush.msra.mxu2 %v814_v47  ;;  %v988_v41 = vld [vmem:[#allocation13 + $0x98] sm:$0xff]  ;;  %v986_v46 = vld [vmem:[#allocation13 + $0x88] sm:$0xff] }
 0x1a4   :  { %884 = vmatpush.msrb.mxu3 %v817_v33  ;;  %865 = vmatpush.msrb.mxu1 %v783_v36  ;;  %v992_v33 = vld [vmem:[#allocation13 + $0xb8] sm:$0xff]  ;;  %v974_v36 = vld [vmem:[#allocation13 + $0x28] sm:$0xff] }
 0x1a6   :  { %885 = vmatpush.msrb.mxu3 %v815_v37  ;;  %866 = vmatpush.msrb.mxu1 %v781_v44  ;;  %v990_v37 = vld [vmem:[#allocation13 + $0xa8] sm:$0xff]  ;;  %v987_v44 = vld [vmem:[#allocation13 + $0x90] sm:$0xff] }
 0x1a8   :  { %886 = vmatpush.msrb.mxu3 %v813_v45  ;;  %1005 = vmatpush.msra.mxu1 %v984_v16  ;;  %v970_v45 = vld [vmem:[#allocation13 + $0x8] sm:$0xff] }
 0x1aa   :  { %1025 = vmatpush.msra.mxu3 %v1000_v17  ;;  %1006 = vmatpush.msra.mxu1 %v983_v18 }
 0x1ac   :  { %1026 = vmatpush.msra.mxu3 %v999_v19  ;;  %1007 = vmatpush.msra.mxu1 %v982_v20 }
 0x1ae   :  { %1027 = vmatpush.msra.mxu3 %v998_v21  ;;  %1008 = vmatpush.msra.mxu1 %v981_v22  ;;  %v1110_v21 = vld [vmem:[%s1494_s10] ss:$0 sm:$0xff]  ;;  %s1360_s10 = smov [#allocation14]  }
 0x1af   :  { %s1073_s14 = sshll.u32 %s1360_s10, 4  ;;  %s1074_s14 = int_to_ptr.vmem [resolvable:$true] %s1073_s14 }
 0x1b0   :  { %1028 = vmatpush.msra.mxu3 %v997_v23  ;;  %1009 = vmatpush.msra.mxu1 %v980_v24 }
 0x1b2   :  { %1029 = vmatpush.msra.mxu3 %v996_v25  ;;  %1010 = vmatpush.msra.mxu1 %v979_v26 }
 0x1b4   :  { %1030 = vmatpush.msra.mxu3 %v995_v27  ;;  %1011 = vmatpush.msra.mxu1 %v978_v28 }
 0x1b6   :  { %1031 = vmatpush.msra.mxu3 %v994_v29  ;;  %1012 = vmatpush.msra.mxu1 %v977_v30 }
 0x1b8   :  { %1032 = vmatpush.msra.mxu3 %v993_v31  ;;  %1013 = vmatpush.msra.mxu1 %v976_v32 }
 0x1ba   :  { %1033 = vmatpush.msra.mxu3 %v992_v33  ;;  %1014 = vmatpush.msra.mxu1 %v975_v34 }
 0x1bc   :  { %1034 = vmatpush.msra.mxu3 %v991_v35  ;;  %1015 = vmatpush.msra.mxu1 %v974_v36 }
 0x1be   :  { %1035 = vmatpush.msra.mxu3 %v990_v37 }
 0x21b   :  { %v680_v42 = vpop.f32.mrf.mxu1  ;;  %v720_v43 = vpop.f32.mrf.mxu0 }
 0x21c   :  { %v681_v48 = vadd.f32 %v680_v42, %v659_v38  ;;  %v721_v49 = vadd.f32 %v720_v43, %v660_v39  ;;  %v973_v38 = vld [vmem:[#allocation13 + $0x20] sm:$0xff]  ;;  %v845_v42 = vld [vmem:[%s1492_s8] sm:$0x3] }
 0x21d   :  { %v989_v39 = vld [vmem:[#allocation13 + $0xa0] sm:$0xff]  ;;  %1016 = vmatpush.msra.mxu1 %v973_v38  ;;  %v971_v43 = vld [vmem:[#allocation13 + $0x10] sm:$0xff]  ;;  %v847_v47 = vperm.slane %v845_v42, 0 }
 0x21e   :  { %1036 = vmatpush.msra.mxu3 %v989_v39 }
 0x21f   :  { %1017 = vmatpush.msra.mxu1 %v972_v40 }
 0x220   :  { %1037 = vmatpush.msra.mxu3 %v988_v41 }
 0x221   :  { %1018 = vmatpush.msra.mxu1 %v971_v43 }
 0x222   :  { %v700_v50 = vpop.f32.mrf.mxu3  ;;  %v740_v51 = vpop.f32.mrf.mxu2  ;;  %1038 = vmatpush.msra.mxu3 %v987_v44 }
 0x223   :  { %v701_v52 = vadd.f32 %v700_v50, %v681_v48  ;;  %v741_v53 = vadd.f32 %v740_v51, %v721_v49  ;;  %v848_v48 = vperm.slane %v845_v42, 1  ;;  %v969_v51 = vld [vmem:[#allocation13] sm:$0xff]  ;;  %1019 = vmatpush.msra.mxu1 %v970_v45 }
 0x224   :  { %1039 = vmatpush.msra.mxu3 %v986_v46 }
 0x225   :  { %v1094_v54 = vmul.f32 -1.442695, %v701_v52  ;;  %v1095_v55 = vmul.f32 -1.442695, %v741_v53  ;;  %v985_v52 = vld [vmem:[#allocation13 + $0x80] sm:$0xff]  ;;  %1020 = vmatpush.msra.mxu1 %v969_v51 }
 0x226   :  { %1040 = vmatpush.msra.mxu3 %v985_v52 }
 0x227   :  { %1127 = vpow2.f32 %v1094_v54 }
 0x228   :  { %1129 = vpow2.f32 %v1095_v55 }
 0x22d   :  { %v1128_v56 = vpop.eup %1127 }
 0x22e   :  { %v1130_v57 = vpop.eup %1129  ;;  %v749_v58 = vadd.f32 1.0, %v1128_v56 }
 0x22f   :  { %v750_v59 = vadd.f32 1.0, %v1130_v57 }
 0x230   :  { %1131 = vrcp.f32 %v749_v58  ;;  %v762_v1 = vand.u32 2147483648, %v749_v58  ;;  %v760_v4 = vand.u32 2147483647, %v749_v58  ;;  %vm756_vm3 = vweird.f32 %v749_v58 }
 0x231   :  { %1133 = vrcp.f32 %v750_v59  ;;  %v777_v5 = vand.u32 2147483648, %v750_v59  ;;  %v775_v7 = vand.u32 2147483647, %v750_v59  ;;  %vm771_vm5 = vweird.f32 %v750_v59 }
 0x232   :  { %v763_v9 = vor.u32 1.1754944e-38, %v762_v1  ;;  %vm761_vm6 = vcmp.eq.f32.partialorder %v760_v4, 8.507059e+37 }
 0x233   :  { %v778_v12 = vor.u32 1.1754944e-38, %v777_v5  ;;  %vm776_vm8 = vcmp.eq.f32.partialorder %v775_v7, 8.507059e+37 }
 0x236   :  { %v1132_v60 = vpop.eup %1131 }
 0x237   :  { %v1134_v61 = vpop.eup %1133  ;;  %v752_v62 = vmul.f32 %v1132_v60, %v749_v58  ;;  %vm757_vm1 = vweird.f32 %v1132_v60 }
 0x238   :  { %v767_v63 = vmul.f32 %v1134_v61, %v750_v59  ;;  %vm772_vm2 = vweird.f32 %v1134_v61  ;;  %vm758_vm4 = vmor %vm756_vm3, %vm757_vm1 }
 0x239   :  { %v753_v0 = vsub.f32 1.0, %v752_v62  ;;  %vm773_vm7 = vmor %vm771_vm5, %vm772_vm2 }
 0x23a   :  { %v768_v2 = vsub.f32 1.0, %v767_v63 }
 0x23b   :  { %v754_v3 = vmul.f32 %v1132_v60, %v753_v0 }
 0x23c   :  { %v769_v6 = vmul.f32 %v1134_v61, %v768_v2 }
 0x23d   :  { %v755_v8 = vadd.f32 %v1132_v60, %v754_v3 }
 0x23e   :  { %v770_v10 = vadd.f32 %v1134_v61, %v769_v6 }
 0x23f   :  { %v759_v11 = vsel %vm758_vm4, %v1132_v60, %v755_v8 }
 0x240   :  { %v764_v13 = vsel %vm761_vm6, %v763_v9, %v759_v11  ;;  %v774_v14 = vsel %vm773_vm7, %v1134_v61, %v770_v10 }
 0x241   :  { %867 = vmatmul.f32.vlgmr.msrb.gmra.mxu1 %v764_v13  ;;  %v779_v15 = vsel %vm776_vm8, %v778_v12, %v774_v14  ;;  %907 = vmatmul.f32.vlgmr.msra.gmra.mxu0 %v764_v13 }
 0x242   :  { %887 = vmatmul.f32.vlgmr.msrb.gmra.mxu3 %v779_v15  ;;  %927 = vmatmul.f32.vlgmr.msra.gmra.mxu2 %v779_v15 }
 0x2be   :  { %v868_v49 = vpop.f32.mrf.mxu1  ;;  %v908_v50 = vpop.f32.mrf.mxu0 }
 0x2bf   :  { %v869_v53 = vadd.f32 %v868_v49, %v847_v47  ;;  %v909_v54 = vadd.f32 %v908_v50, %v848_v48 }
 0x2c5   :  { %v888_v55 = vpop.f32.mrf.mxu3  ;;  %v928_v56 = vpop.f32.mrf.mxu2 }
 0x2c6   :  { %v889_v57 = vadd.f32 %v888_v55, %v869_v53  ;;  %v929_v58 = vadd.f32 %v928_v56, %v909_v54 }
 0x2c8   :  { %v1096_v59 = vmul.f32 -1.442695, %v889_v57  ;;  %v1097_v60 = vmul.f32 -1.442695, %v929_v58 }
 0x2ca   :  { %1135 = vpow2.f32 %v1096_v59 }
 0x2cb   :  { %1137 = vpow2.f32 %v1097_v60 }
 0x2d0   :  { %v1136_v61 = vpop.eup %1135 }
 0x2d1   :  { %v1138_v62 = vpop.eup %1137  ;;  %v937_v63 = vadd.f32 1.0, %v1136_v61 }
 0x2d2   :  { %v938_v0 = vadd.f32 1.0, %v1138_v62 }
 0x2d3   :  { %1139 = vrcp.f32 %v937_v63  ;;  %v950_v6 = vand.u32 2147483648, %v937_v63  ;;  %v948_v9 = vand.u32 2147483647, %v937_v63  ;;  %vm944_vm11 = vweird.f32 %v937_v63 }
 0x2d4   :  { %1141 = vrcp.f32 %v938_v0  ;;  %v965_v10 = vand.u32 2147483648, %v938_v0  ;;  %v963_v12 = vand.u32 2147483647, %v938_v0  ;;  %vm959_vm13 = vweird.f32 %v938_v0 }
 0x2d5   :  { %v951_v14 = vor.u32 1.1754944e-38, %v950_v6  ;;  %vm949_vm14 = vcmp.eq.f32.partialorder %v948_v9, 8.507059e+37 }
 0x2d6   :  { %v966_v17 = vor.u32 1.1754944e-38, %v965_v10  ;;  %vm964_vm0 = vcmp.eq.f32.partialorder %v963_v12, 8.507059e+37 }
 0x2d9   :  { %v1140_v1 = vpop.eup %1139 }
 0x2da   :  { %v1142_v2 = vpop.eup %1141  ;;  %v940_v3 = vmul.f32 %v1140_v1, %v937_v63  ;;  %vm945_vm9 = vweird.f32 %v1140_v1 }
 0x2db   :  { %v955_v4 = vmul.f32 %v1142_v2, %v938_v0  ;;  %vm960_vm10 = vweird.f32 %v1142_v2  ;;  %vm946_vm12 = vmor %vm944_vm11, %vm945_vm9 }
 0x2dc   :  { %v941_v5 = vsub.f32 1.0, %v940_v3  ;;  %vm961_vm15 = vmor %vm959_vm13, %vm960_vm10 }
 0x2dd   :  { %v956_v7 = vsub.f32 1.0, %v955_v4 }
 0x2de   :  { %v942_v8 = vmul.f32 %v1140_v1, %v941_v5 }
 0x2df   :  { %v957_v11 = vmul.f32 %v1142_v2, %v956_v7 }
 0x2e0   :  { %v943_v13 = vadd.f32 %v1140_v1, %v942_v8 }
 0x2e1   :  { %v958_v15 = vadd.f32 %v1142_v2, %v957_v11 }
 0x2e2   :  { %v947_v16 = vsel %vm946_vm12, %v1140_v1, %v943_v13 }
 0x2e3   :  { %v952_v18 = vsel %vm949_vm14, %v951_v14, %v947_v16  ;;  %v962_v19 = vsel %vm961_vm15, %v1142_v2, %v958_v15 }
 0x2e4   :  { %1021 = vmatmul.f32.vlgmr.msra.gmra.mxu1 %v952_v18  ;;  %v967_v20 = vsel %vm964_vm0, %v966_v17, %v962_v19 }
 0x2e5   :  { %1041 = vmatmul.f32.vlgmr.msra.gmra.mxu3 %v967_v20 }
 0x361   :  { %v1022_v22 = vpop.f32.mrf.mxu1 }
 0x362   :  { %v1023_v23 = vadd.f32 %v1110_v21, %v1022_v22 }
 0x368   :  { %v1042_v24 = vpop.f32.mrf.mxu3 }
 0x369   :  { %v1043_v25 = vadd.f32 %v1042_v24, %v1023_v23 }
 0x36b   :  { %1045 = vmax.xlane.f32.xlu0 %v1043_v25 }
 0x3de   :  { %v1046_v26 = vpop.xlane.xlu0 %1045 }
 0x3df   :  { %v1047_v27 = vsub.f32 %v1043_v25, %v1046_v26 }
 0x3e1   :  { %v1048_v28 = vmul.f32 1.442695, %v1047_v27 }
 0x3e3   :  { %1143 = vpow2.f32 %v1048_v28 }
 0x3e9   :  { %v1144_v29 = vpop.eup %1143 }
 0x3ea   :  { %1050 = vadd.xlane.f32.xlu0 %v1144_v29 }
 0x45d   :  { %v1051_v30 = vpop.xlane.xlu0 %1050 }
 0x45e   :  { %1145 = vrcp.f32 %v1051_v30  ;;  %v1063_v34 = vand.u32 2147483648, %v1051_v30  ;;  %v1061_v36 = vand.u32 2147483647, %v1051_v30  ;;  %vm1057_vm2 = vweird.f32 %v1051_v30 }
 0x460   :  { %v1064_v38 = vor.u32 1.1754944e-38, %v1063_v34  ;;  %vm1062_vm4 = vcmp.eq.f32.partialorder %v1061_v36, 8.507059e+37 }
 0x464   :  { %v1146_v31 = vpop.eup %1145 }
 0x465   :  { %v1053_v32 = vmul.f32 %v1146_v31, %v1051_v30  ;;  %vm1058_vm1 = vweird.f32 %v1146_v31 }
 0x466   :  { %vm1059_vm3 = vmor %vm1057_vm2, %vm1058_vm1 }
 0x467   :  { %v1054_v33 = vsub.f32 1.0, %v1053_v32 }
 0x469   :  { %v1055_v35 = vmul.f32 %v1146_v31, %v1054_v33 }
 0x46b   :  { %v1056_v37 = vadd.f32 %v1146_v31, %v1055_v35 }
 0x46d   :  { %v1060_v39 = vsel %vm1059_vm3, %v1146_v31, %v1056_v37 }
 0x46e   :  { %v1065_v40 = vsel %vm1062_vm4, %v1064_v38, %v1060_v39 }
 0x46f   :  { %v1066_v41 = vmul.f32 %v1144_v29, %v1065_v40 }
 0x471   :  { %1067 = vst [vmem:[#allocation14] sm:$0xff] %v1066_v41 }
 0x472   :  { %1078 = dma.vmem_to_hbm [thread:$0]  %s1074_s14, 128, %s1076_s7, [#allocation4]  }
 0x473   :  { %1347 = dma.done.wait [#allocation4], 128  }
 0x474   :  { %1348 = vsyncadd [#allocation4], 4294967168 }
 0x475   :  { %1083 = vsyncpa [#allocation3], 1 }
 0x476   :  { %1084 = vsyncpa [#allocation6], 1 }
 0x477   :  { %1085 = vsyncpa [#allocation9], 1 }
 0x478   :  { %1086 = vsyncpa [#allocation12], 1 }
 0x479   :  { %1087 = vsyncpa [#allocation4], 1 }

</bundles_post_ra>
